<compile_context>
chip_gen: v6e
topology: v6e:2x2x1
jax: 0.10.0
libtpu: 0.0.40
codegen_flags: <defaults>
</compile_context>

<pallas_src>
import functools

import jax
import jax.numpy as jnp
from jax.experimental import pallas as pl
from jax.experimental.pallas import tpu as pltpu

LANE = 128          # TPU lane width
CPAD = 128          # padded channel width flowing between layers / class-dim pad
HIDDEN = 128        # fc1 hidden size (fixed by the PyTorch module)
MAX_TM = 512        # max im2col rows (batch folded into M) per conv matmul block
MAX_TB = 256        # max batch rows per MLP block


def _round_up(x, m):
    return ((x + m - 1) // m) * m


def _tile(m, max_t):
    """Pick (padded_extent, tile_size) for an M-like dim."""
    if m <= max_t:
        t = _round_up(m, 8)
        return t, t
    return _round_up(m, max_t), max_t


# ------------------------------- Pallas kernels -------------------------------

def _conv_relu_pool_kernel(p_ref, w_ref, b_ref, o_ref):
    """Fused Conv2d(matmul) + bias + ReLU + 2x2 maxpool.

    p_ref: (4, TM, Kp) bf16 -- im2col patches, axis 0 = position inside the 2x2 pool window
    w_ref: (Kp, 128)  bf16 -- weight rows ordered [kh, kw, cin], zero padded (K and Cout)
    b_ref: (1, 128)   f32
    o_ref: (TM, 128)  bf16 -- pooled activations (lane-dense, channel padded)
    """
    w = w_ref[...]
    r0 = jnp.dot(p_ref[0], w, preferred_element_type=jnp.float32)
    r1 = jnp.dot(p_ref[1], w, preferred_element_type=jnp.float32)
    r2 = jnp.dot(p_ref[2], w, preferred_element_type=jnp.float32)
    r3 = jnp.dot(p_ref[3], w, preferred_element_type=jnp.float32)
    m = jnp.maximum(jnp.maximum(r0, r1), jnp.maximum(r2, r3))
    # bias add and ReLU commute with the max (same bias on all 4 window positions)
    o_ref[...] = jnp.maximum(m + b_ref[...], 0.0).astype(o_ref.dtype)


def conv_relu_pool(patches, w, b, tm):
    """patches (4, Mp, Kp) bf16, w (Kp, 128) bf16, b (1, 128) f32 -> (Mp, 128) bf16."""
    _, m_pad, kp = patches.shape
    return pl.pallas_call(
        _conv_relu_pool_kernel,
        out_shape=jax.ShapeDtypeStruct((m_pad, CPAD), jnp.bfloat16),
        grid=(m_pad // tm,),
        in_specs=[
            pl.BlockSpec((4, tm, kp), lambda i: (0, i, 0)),
            pl.BlockSpec((kp, CPAD), lambda i: (0, 0)),
            pl.BlockSpec((1, CPAD), lambda i: (0, 0)),
        ],
        out_specs=pl.BlockSpec((tm, CPAD), lambda i: (i, 0)),
        compiler_params=pltpu.CompilerParams(dimension_semantics=("parallel",)),
    )(patches, w, b)


def _mlp_kernel(x_ref, w1_ref, b1_ref, w2_ref, b2_ref, o_ref):
    """Fused fc1 + ReLU + fc2 (class dim lane-padded to 128)."""
    h = jnp.dot(x_ref[...], w1_ref[...], preferred_element_type=jnp.float32)
    h = jnp.maximum(h + b1_ref[...], 0.0)
    y = jnp.dot(h.astype(w2_ref.dtype), w2_ref[...], preferred_element_type=jnp.float32)
    o_ref[...] = (y + b2_ref[...]).astype(o_ref.dtype)


def mlp_head(x, w1, b1, w2, b2):
    n, f = x.shape
    n_pad, tb = _tile(n, MAX_TB)
    if n_pad > n:
        x = jnp.pad(x, ((0, n_pad - n), (0, 0)))
    out = pl.pallas_call(
        _mlp_kernel,
        out_shape=jax.ShapeDtypeStruct((n_pad, CPAD), jnp.float32),
        grid=(n_pad // tb,),
        in_specs=[
            pl.BlockSpec((tb, f), lambda i: (i, 0)),
            pl.BlockSpec((f, HIDDEN), lambda i: (0, 0)),
            pl.BlockSpec((1, HIDDEN), lambda i: (0, 0)),
            pl.BlockSpec((HIDDEN, CPAD), lambda i: (0, 0)),
            pl.BlockSpec((1, CPAD), lambda i: (0, 0)),
        ],
        out_specs=pl.BlockSpec((tb, CPAD), lambda i: (i, 0)),
        compiler_params=pltpu.CompilerParams(dimension_semantics=("parallel",)),
    )(x, w1, b1, w2, b2)
    return out[:n]


# ------------------------------- JAX glue (layout only, fused under jit) -------------------------------

def _im2col_pool_groups(x_nhwc, k, stride, hp, wp, k_pad, m_pad):
    """NHWC activation -> (4, m_pad, k_pad) bf16 patches.

    Axis 0 enumerates the 4 positions inside each 2x2 maxpool window; only conv output
    positions kept by the pool are materialized (PyTorch floor-truncation semantics).
    Patch column order is [kh, kw, cin] (conv weight is pre-reordered at init to match).
    Row order is (batch, hp, wp), i.e. batch folded into the matmul M dimension.
    """
    n = x_nhwc.shape[0]
    c = x_nhwc.shape[-1]
    hout, wout = 2 * hp, 2 * wp
    cols = []
    for kh in range(k):
        for kw in range(k):
            cols.append(x_nhwc[:, kh:kh + stride * hout:stride,
                                  kw:kw + stride * wout:stride, :])
    p = jnp.concatenate(cols, axis=-1)                  # (N, 2hp, 2wp, k*k*c)
    kk = k * k * c
    p = p.reshape(n, hp, 2, wp, 2, kk)
    p = p.transpose(2, 4, 0, 1, 3, 5)                   # (dh, dw, N, hp, wp, kk)
    p = p.reshape(4, n * hp * wp, kk)
    pad_m = m_pad - n * hp * wp
    pad_k = k_pad - kk
    if pad_m or pad_k:
        p = jnp.pad(p, ((0, 0), (0, pad_m), (0, pad_k)))
    return p.astype(jnp.bfloat16)


def cnn_forward(params, x, *, cfg):
    """Matches CNN.forward: [conv -> relu -> pool]* -> flatten -> fc1 -> relu -> fc2."""
    conv_cfg, num_classes = cfg
    n = x.shape[0]
    x = x.transpose(0, 2, 3, 1)                         # NCHW -> NHWC (once, at entry)
    for (k, s, hp, wp, k_pad), layer in zip(conv_cfg, params["conv"]):
        m = n * hp * wp
        m_pad, tm = _tile(m, MAX_TM)
        patches = _im2col_pool_groups(x, k, s, hp, wp, k_pad, m_pad)
        y = conv_relu_pool(patches, layer["w"], layer["b"], tm)   # (m_pad, 128) bf16
        x = y[:m].reshape(n, hp, wp, CPAD)
    feat = x.reshape(n, -1)                             # (N, hp*wp*128) bf16
    out = mlp_head(feat, params["fc1_w"], params["fc1_b"],
                   params["fc2_w"], params["fc2_b"])    # (N, 128) f32
    return out[:, :num_classes]


# ------------------------------- Params (all layout work hoisted here) -------------------------------

def init_cnn_params(key, img_size, in_channels, num_classes, conv_layers):
    """PyTorch-style uniform init; weights pre-reordered / lane-padded / bf16-cast.

    Also returns the raw (PyTorch-layout, f32) weights for a reference check."""
    h, w = img_size
    cin = in_channels
    conv_params, conv_cfg, raw_conv = [], [], []
    for li, (cout, k, s) in enumerate(conv_layers):
        key, kw_, kb_ = jax.random.split(key, 3)
        fan_in = cin * k * k
        bound = 1.0 / (fan_in ** 0.5)
        W = jax.random.uniform(kw_, (cout, cin, k, k), jnp.float32, -bound, bound)
        B = jax.random.uniform(kb_, (cout,), jnp.float32, -bound, bound)
        raw_conv.append((W, B, s))

        # channel width of the NHWC activation this layer actually sees
        c_act = cin if li == 0 else CPAD
        kk = k * k * c_act
        k_pad = _round_up(kk, LANE)

        W_act = W if c_act == cin else jnp.pad(W, ((0, 0), (0, c_act - cin), (0, 0), (0, 0)))
        wmat = W_act.transpose(2, 3, 1, 0).reshape(kk, cout)         # rows = [kh, kw, cin]
        wmat = jnp.pad(wmat, ((0, k_pad - kk), (0, CPAD - cout)))    # pad K and lane-pad Cout
        bias = jnp.pad(B, (0, CPAD - cout)).reshape(1, CPAD)

        conv_params.append({"w": wmat.astype(jnp.bfloat16),
                            "b": bias.astype(jnp.float32)})

        hconv = (h - k) // s + 1
        wconv = (w - k) // s + 1
        hp, wp = hconv // 2, wconv // 2                              # conv (no pad) + pool 2x2/2
        conv_cfg.append((k, s, hp, wp, k_pad))
        h, w, cin = hp, wp, cout

    flattened = cin * h * w

    key, k1, k2, k3, k4 = jax.random.split(key, 5)
    b1 = 1.0 / (flattened ** 0.5)
    fc1_w = jax.random.uniform(k1, (HIDDEN, flattened), jnp.float32, -b1, b1)
    fc1_b = jax.random.uniform(k2, (HIDDEN,), jnp.float32, -b1, b1)
    b2 = 1.0 / (HIDDEN ** 0.5)
    fc2_w = jax.random.uniform(k3, (num_classes, HIDDEN), jnp.float32, -b2, b2)
    fc2_b = jax.random.uniform(k4, (num_classes,), jnp.float32, -b2, b2)

    # fc1: absorb the (h, w, padded-channel) activation layout into the weight so no
    # transpose / channel-slice is needed between the last conv and fc1 at run time.
    w1 = fc1_w.reshape(HIDDEN, cin, h, w).transpose(2, 3, 1, 0)      # (h, w, c, hidden)
    w1 = jnp.pad(w1, ((0, 0), (0, 0), (0, CPAD - cin), (0, 0)))
    w1 = w1.reshape(h * w * CPAD, HIDDEN)

    # fc2: lane-pad num_classes -> 128 (sliced off after the kernel)
    w2 = jnp.pad(fc2_w.T, ((0, 0), (0, CPAD - num_classes)))
    b2v = jnp.pad(fc2_b, (0, CPAD - num_classes))

    params = {
        "conv": conv_params,
        "fc1_w": w1.astype(jnp.bfloat16),
        "fc1_b": fc1_b.reshape(1, HIDDEN).astype(jnp.float32),
        "fc2_w": w2.astype(jnp.bfloat16),
        "fc2_b": b2v.reshape(1, CPAD).astype(jnp.float32),
    }
    raw = {"conv": raw_conv, "fc1_w": fc1_w, "fc1_b": fc1_b,
           "fc2_w": fc2_w, "fc2_b": fc2_b}
    cfg = (tuple(conv_cfg), num_classes)
    return params, raw, flattened, cfg


# ------------------------------- Pure-JAX f32 reference (for correctness check) -------------------------------

def cnn_reference(raw, x):
    hp = jax.lax.Precision.HIGHEST
    for (W, B, s) in raw["conv"]:
        x = jax.lax.conv_general_dilated(
            x, W, window_strides=(s, s), padding="VALID",
            dimension_numbers=("NCHW", "OIHW", "NCHW"), precision=hp)
        x = jax.nn.relu(x + B[None, :, None, None])
        x = jax.lax.reduce_window(x, -jnp.inf, jax.lax.max,
                                  (1, 1, 2, 2), (1, 1, 2, 2), "VALID")
    x = x.reshape(x.shape[0], -1)
    x = jax.nn.relu(jnp.dot(x, raw["fc1_w"].T, precision=hp) + raw["fc1_b"])
    return jnp.dot(x, raw["fc2_w"].T, precision=hp) + raw["fc2_b"]


# ------------------------------- Main -------------------------------

if __name__ == "__main__":
    img_size = (16, 16)
    in_channels = 4
    num_classes = 10
    conv_layers = [(8, 3, 1), (16, 3, 1)]   # (out_channels, kernel_size, stride)

    key = jax.random.PRNGKey(0)
    key, kx = jax.random.split(key)
    params, raw, flattened, cfg = init_cnn_params(
        key, img_size, in_channels, num_classes, conv_layers)

    x = jax.random.normal(kx, (2, in_channels, *img_size), jnp.float32)

    forward = jax.jit(functools.partial(cnn_forward, cfg=cfg))
    out = jax.block_until_ready(forward(params, x))

    assert out.shape == (2, num_classes), out.shape
    assert bool(jnp.all(jnp.isfinite(out)))

    ref = cnn_reference(raw, x)
    err = float(jnp.max(jnp.abs(out - ref)))
    assert err < 0.1, f"max abs error vs f32 reference: {err}"

    print("KERNEL_OK")
</pallas_src>

<mosaic_0001>
module attributes {stable_mosaic.version = 11 : i64} {
  func.func @_conv_relu_pool_kernel(%arg0: i32, %arg1: memref<4x104x128xbf16, #tpu.memory_space<vmem>>, %arg2: memref<128x128xbf16, #tpu.memory_space<vmem>>, %arg3: memref<1x128xf32, #tpu.memory_space<vmem>>, %arg4: memref<104x128xbf16, #tpu.memory_space<vmem>>) attributes {dimension_semantics = [#tpu.dimension_semantics<parallel>], iteration_bounds = array<i64: 1>, scalar_prefetch = 0 : i64, scratch_operands = 0 : i64, tpu.core_type = #tpu.core_type<tc>, window_params = [{transform_indices = @transform_0, window_bounds = array<i64: 4, 104, 128>}, {pipeline_mode = #tpu.pipeline_mode<synchronous>, transform_indices = @transform_1, window_bounds = array<i64: 128, 128>}, {pipeline_mode = #tpu.pipeline_mode<synchronous>, transform_indices = @transform_2, window_bounds = array<i64: 1, 128>}, {transform_indices = @transform_3, window_bounds = array<i64: 104, 128>}]} {
    %c0 = arith.constant 0 : index
    %c0_0 = arith.constant 0 : index
    %0 = vector.load %arg2[%c0, %c0_0] : memref<128x128xbf16, #tpu.memory_space<vmem>>, vector<128x128xbf16>
    %c0_1 = arith.constant 0 : index
    %c0_2 = arith.constant 0 : index
    %c0_3 = arith.constant 0 : index
    %1 = vector.load %arg1[%c0_1, %c0_2, %c0_3] : memref<4x104x128xbf16, #tpu.memory_space<vmem>>, vector<1x104x128xbf16>
    %2 = vector.shape_cast %1 : vector<1x104x128xbf16> to vector<104x128xbf16>
    %cst = arith.constant dense<0.000000e+00> : vector<104x128xf32>
    %3 = tpu.matmul %2, %0, %cst {dimension_numbers = #tpu.dot_dimension_numbers<[1], [0], [0], [1], [0, 0, 1, 1], [], []>} : vector<104x128xbf16>, vector<128x128xbf16>, vector<104x128xf32> -> vector<104x128xf32>
    %c1 = arith.constant 1 : index
    %c0_4 = arith.constant 0 : index
    %c0_5 = arith.constant 0 : index
    %4 = vector.load %arg1[%c1, %c0_4, %c0_5] : memref<4x104x128xbf16, #tpu.memory_space<vmem>>, vector<1x104x128xbf16>
    %5 = vector.shape_cast %4 : vector<1x104x128xbf16> to vector<104x128xbf16>
    %cst_6 = arith.constant dense<0.000000e+00> : vector<104x128xf32>
    %6 = tpu.matmul %5, %0, %cst_6 {dimension_numbers = #tpu.dot_dimension_numbers<[1], [0], [0], [1], [0, 0, 1, 1], [], []>} : vector<104x128xbf16>, vector<128x128xbf16>, vector<104x128xf32> -> vector<104x128xf32>
    %c2 = arith.constant 2 : index
    %c0_7 = arith.constant 0 : index
    %c0_8 = arith.constant 0 : index
    %7 = vector.load %arg1[%c2, %c0_7, %c0_8] : memref<4x104x128xbf16, #tpu.memory_space<vmem>>, vector<1x104x128xbf16>
    %8 = vector.shape_cast %7 : vector<1x104x128xbf16> to vector<104x128xbf16>
    %cst_9 = arith.constant dense<0.000000e+00> : vector<104x128xf32>
    %9 = tpu.matmul %8, %0, %cst_9 {dimension_numbers = #tpu.dot_dimension_numbers<[1], [0], [0], [1], [0, 0, 1, 1], [], []>} : vector<104x128xbf16>, vector<128x128xbf16>, vector<104x128xf32> -> vector<104x128xf32>
    %c3 = arith.constant 3 : index
    %c0_10 = arith.constant 0 : index
    %c0_11 = arith.constant 0 : index
    %10 = vector.load %arg1[%c3, %c0_10, %c0_11] : memref<4x104x128xbf16, #tpu.memory_space<vmem>>, vector<1x104x128xbf16>
    %11 = vector.shape_cast %10 : vector<1x104x128xbf16> to vector<104x128xbf16>
    %cst_12 = arith.constant dense<0.000000e+00> : vector<104x128xf32>
    %12 = tpu.matmul %11, %0, %cst_12 {dimension_numbers = #tpu.dot_dimension_numbers<[1], [0], [0], [1], [0, 0, 1, 1], [], []>} : vector<104x128xbf16>, vector<128x128xbf16>, vector<104x128xf32> -> vector<104x128xf32>
    %13 = arith.maximumf %3, %6 : vector<104x128xf32>
    %14 = arith.maximumf %9, %12 : vector<104x128xf32>
    %15 = arith.maximumf %13, %14 : vector<104x128xf32>
    %c0_13 = arith.constant 0 : index
    %c0_14 = arith.constant 0 : index
    %16 = vector.load %arg3[%c0_13, %c0_14] : memref<1x128xf32, #tpu.memory_space<vmem>>, vector<1x128xf32>
    %17 = vector.broadcast %16 : vector<1x128xf32> to vector<104x128xf32>
    %18 = arith.addf %15, %17 : vector<104x128xf32>
    %cst_15 = arith.constant 0.000000e+00 : f32
    %19 = vector.broadcast %cst_15 : f32 to vector<104x128xf32>
    %20 = arith.maximumf %18, %19 : vector<104x128xf32>
    %21 = arith.truncf %20 : vector<104x128xf32> to vector<104x128xbf16>
    %c0_16 = arith.constant 0 : index
    %c0_17 = arith.constant 0 : index
    %22 = vector.load %arg4[%c0_16, %c0_17] : memref<104x128xbf16, #tpu.memory_space<vmem>>, vector<104x128xbf16>
    tpu.vector_store %arg4[%c0_16, %c0_17], %21 {strides = array<i32>} : memref<104x128xbf16, #tpu.memory_space<vmem>>, vector<104x128xbf16>,
    return
  }
  func.func @transform_0(%arg0: i32) -> (i32, i32, i32) {
    %c0_i32 = arith.constant 0 : i32
    %c0_i32_0 = arith.constant 0 : i32
    %c0_i32_1 = arith.constant 0 : i32
    return %c0_i32, %arg0, %c0_i32_0 : i32, i32, i32
  }
  func.func @transform_1(%arg0: i32) -> (i32, i32) {
    %c0_i32 = arith.constant 0 : i32
    %c0_i32_0 = arith.constant 0 : i32
    %c0_i32_1 = arith.constant 0 : i32
    return %c0_i32, %c0_i32_0 : i32, i32
  }
  func.func @transform_2(%arg0: i32) -> (i32, i32) {
    %c0_i32 = arith.constant 0 : i32
    %c0_i32_0 = arith.constant 0 : i32
    %c0_i32_1 = arith.constant 0 : i32
    return %c0_i32, %c0_i32_0 : i32, i32
  }
  func.func @transform_3(%arg0: i32) -> (i32, i32) {
    %c0_i32 = arith.constant 0 : i32
    %c0_i32_0 = arith.constant 0 : i32
    return %arg0, %c0_i32 : i32, i32
  }
}

module attributes {stable_mosaic.version = 11 : i64} {
  func.func @_conv_relu_pool_kernel(%arg0: i32, %arg1: memref<4x8x1152xbf16, #tpu.memory_space<vmem>>, %arg2: memref<1152x128xbf16, #tpu.memory_space<vmem>>, %arg3: memref<1x128xf32, #tpu.memory_space<vmem>>, %arg4: memref<8x128xbf16, #tpu.memory_space<vmem>>) attributes {dimension_semantics = [#tpu.dimension_semantics<parallel>], iteration_bounds = array<i64: 1>, scalar_prefetch = 0 : i64, scratch_operands = 0 : i64, tpu.core_type = #tpu.core_type<tc>, window_params = [{transform_indices = @transform_0, window_bounds = array<i64: 4, 8, 1152>}, {pipeline_mode = #tpu.pipeline_mode<synchronous>, transform_indices = @transform_1, window_bounds = array<i64: 1152, 128>}, {pipeline_mode = #tpu.pipeline_mode<synchronous>, transform_indices = @transform_2, window_bounds = array<i64: 1, 128>}, {transform_indices = @transform_3, window_bounds = array<i64: 8, 128>}]} {
    %c0 = arith.constant 0 : index
    %c0_0 = arith.constant 0 : index
    %0 = vector.load %arg2[%c0, %c0_0] : memref<1152x128xbf16, #tpu.memory_space<vmem>>, vector<1152x128xbf16>
    %c0_1 = arith.constant 0 : index
    %c0_2 = arith.constant 0 : index
    %c0_3 = arith.constant 0 : index
    %1 = vector.load %arg1[%c0_1, %c0_2, %c0_3] : memref<4x8x1152xbf16, #tpu.memory_space<vmem>>, vector<1x8x1152xbf16>
    %2 = vector.shape_cast %1 : vector<1x8x1152xbf16> to vector<8x1152xbf16>
    %cst = arith.constant dense<0.000000e+00> : vector<8x128xf32>
    %3 = tpu.matmul %2, %0, %cst {dimension_numbers = #tpu.dot_dimension_numbers<[1], [0], [0], [1], [0, 0, 1, 1], [], []>} : vector<8x1152xbf16>, vector<1152x128xbf16>, vector<8x128xf32> -> vector<8x128xf32>
    %c1 = arith.constant 1 : index
    %c0_4 = arith.constant 0 : index
    %c0_5 = arith.constant 0 : index
    %4 = vector.load %arg1[%c1, %c0_4, %c0_5] : memref<4x8x1152xbf16, #tpu.memory_space<vmem>>, vector<1x8x1152xbf16>
    %5 = vector.shape_cast %4 : vector<1x8x1152xbf16> to vector<8x1152xbf16>
    %cst_6 = arith.constant dense<0.000000e+00> : vector<8x128xf32>
    %6 = tpu.matmul %5, %0, %cst_6 {dimension_numbers = #tpu.dot_dimension_numbers<[1], [0], [0], [1], [0, 0, 1, 1], [], []>} : vector<8x1152xbf16>, vector<1152x128xbf16>, vector<8x128xf32> -> vector<8x128xf32>
    %c2 = arith.constant 2 : index
    %c0_7 = arith.constant 0 : index
    %c0_8 = arith.constant 0 : index
    %7 = vector.load %arg1[%c2, %c0_7, %c0_8] : memref<4x8x1152xbf16, #tpu.memory_space<vmem>>, vector<1x8x1152xbf16>
    %8 = vector.shape_cast %7 : vector<1x8x1152xbf16> to vector<8x1152xbf16>
    %cst_9 = arith.constant dense<0.000000e+00> : vector<8x128xf32>
    %9 = tpu.matmul %8, %0, %cst_9 {dimension_numbers = #tpu.dot_dimension_numbers<[1], [0], [0], [1], [0, 0, 1, 1], [], []>} : vector<8x1152xbf16>, vector<1152x128xbf16>, vector<8x128xf32> -> vector<8x128xf32>
    %c3 = arith.constant 3 : index
    %c0_10 = arith.constant 0 : index
    %c0_11 = arith.constant 0 : index
    %10 = vector.load %arg1[%c3, %c0_10, %c0_11] : memref<4x8x1152xbf16, #tpu.memory_space<vmem>>, vector<1x8x1152xbf16>
    %11 = vector.shape_cast %10 : vector<1x8x1152xbf16> to vector<8x1152xbf16>
    %cst_12 = arith.constant dense<0.000000e+00> : vector<8x128xf32>
    %12 = tpu.matmul %11, %0, %cst_12 {dimension_numbers = #tpu.dot_dimension_numbers<[1], [0], [0], [1], [0, 0, 1, 1], [], []>} : vector<8x1152xbf16>, vector<1152x128xbf16>, vector<8x128xf32> -> vector<8x128xf32>
    %13 = arith.maximumf %3, %6 : vector<8x128xf32>
    %14 = arith.maximumf %9, %12 : vector<8x128xf32>
    %15 = arith.maximumf %13, %14 : vector<8x128xf32>
    %c0_13 = arith.constant 0 : index
    %c0_14 = arith.constant 0 : index
    %16 = vector.load %arg3[%c0_13, %c0_14] : memref<1x128xf32, #tpu.memory_space<vmem>>, vector<1x128xf32>
    %17 = vector.broadcast %16 : vector<1x128xf32> to vector<8x128xf32>
    %18 = arith.addf %15, %17 : vector<8x128xf32>
    %cst_15 = arith.constant 0.000000e+00 : f32
    %19 = vector.broadcast %cst_15 : f32 to vector<8x128xf32>
    %20 = arith.maximumf %18, %19 : vector<8x128xf32>
    %21 = arith.truncf %20 : vector<8x128xf32> to vector<8x128xbf16>
    %c0_16 = arith.constant 0 : index
    %c0_17 = arith.constant 0 : index
    %22 = vector.load %arg4[%c0_16, %c0_17] : memref<8x128xbf16, #tpu.memory_space<vmem>>, vector<8x128xbf16>
    tpu.vector_store %arg4[%c0_16, %c0_17], %21 {strides = array<i32>} : memref<8x128xbf16, #tpu.memory_space<vmem>>, vector<8x128xbf16>,
    return
  }
  func.func @transform_0(%arg0: i32) -> (i32, i32, i32) {
    %c0_i32 = arith.constant 0 : i32
    %c0_i32_0 = arith.constant 0 : i32
    %c0_i32_1 = arith.constant 0 : i32
    return %c0_i32, %arg0, %c0_i32_0 : i32, i32, i32
  }
  func.func @transform_1(%arg0: i32) -> (i32, i32) {
    %c0_i32 = arith.constant 0 : i32
    %c0_i32_0 = arith.constant 0 : i32
    %c0_i32_1 = arith.constant 0 : i32
    return %c0_i32, %c0_i32_0 : i32, i32
  }
  func.func @transform_2(%arg0: i32) -> (i32, i32) {
    %c0_i32 = arith.constant 0 : i32
    %c0_i32_0 = arith.constant 0 : i32
    %c0_i32_1 = arith.constant 0 : i32
    return %c0_i32, %c0_i32_0 : i32, i32
  }
  func.func @transform_3(%arg0: i32) -> (i32, i32) {
    %c0_i32 = arith.constant 0 : i32
    %c0_i32_0 = arith.constant 0 : i32
    return %arg0, %c0_i32 : i32, i32
  }
}

module attributes {stable_mosaic.version = 11 : i64} {
  func.func @_mlp_kernel(%arg0: i32, %arg1: memref<8x512xbf16, #tpu.memory_space<vmem>>, %arg2: memref<512x128xbf16, #tpu.memory_space<vmem>>, %arg3: memref<1x128xf32, #tpu.memory_space<vmem>>, %arg4: memref<128x128xbf16, #tpu.memory_space<vmem>>, %arg5: memref<1x128xf32, #tpu.memory_space<vmem>>, %arg6: memref<8x128xf32, #tpu.memory_space<vmem>>) attributes {dimension_semantics = [#tpu.dimension_semantics<parallel>], iteration_bounds = array<i64: 1>, scalar_prefetch = 0 : i64, scratch_operands = 0 : i64, tpu.core_type = #tpu.core_type<tc>, window_params = [{transform_indices = @transform_0, window_bounds = array<i64: 8, 512>}, {pipeline_mode = #tpu.pipeline_mode<synchronous>, transform_indices = @transform_1, window_bounds = array<i64: 512, 128>}, {pipeline_mode = #tpu.pipeline_mode<synchronous>, transform_indices = @transform_2, window_bounds = array<i64: 1, 128>}, {pipeline_mode = #tpu.pipeline_mode<synchronous>, transform_indices = @transform_3, window_bounds = array<i64: 128, 128>}, {pipeline_mode = #tpu.pipeline_mode<synchronous>, transform_indices = @transform_4, window_bounds = array<i64: 1, 128>}, {transform_indices = @transform_5, window_bounds = array<i64: 8, 128>}]} {
    %c0 = arith.constant 0 : index
    %c0_0 = arith.constant 0 : index
    %0 = vector.load %arg1[%c0, %c0_0] : memref<8x512xbf16, #tpu.memory_space<vmem>>, vector<8x512xbf16>
    %c0_1 = arith.constant 0 : index
    %c0_2 = arith.constant 0 : index
    %1 = vector.load %arg2[%c0_1, %c0_2] : memref<512x128xbf16, #tpu.memory_space<vmem>>, vector<512x128xbf16>
    %cst = arith.constant dense<0.000000e+00> : vector<8x128xf32>
    %2 = tpu.matmul %0, %1, %cst {dimension_numbers = #tpu.dot_dimension_numbers<[1], [0], [0], [1], [0, 0, 1, 1], [], []>} : vector<8x512xbf16>, vector<512x128xbf16>, vector<8x128xf32> -> vector<8x128xf32>
    %c0_3 = arith.constant 0 : index
    %c0_4 = arith.constant 0 : index
    %3 = vector.load %arg3[%c0_3, %c0_4] : memref<1x128xf32, #tpu.memory_space<vmem>>, vector<1x128xf32>
    %4 = vector.broadcast %3 : vector<1x128xf32> to vector<8x128xf32>
    %5 = arith.addf %2, %4 : vector<8x128xf32>
    %cst_5 = arith.constant 0.000000e+00 : f32
    %6 = vector.broadcast %cst_5 : f32 to vector<8x128xf32>
    %7 = arith.maximumf %5, %6 : vector<8x128xf32>
    %8 = arith.truncf %7 : vector<8x128xf32> to vector<8x128xbf16>
    %c0_6 = arith.constant 0 : index
    %c0_7 = arith.constant 0 : index
    %9 = vector.load %arg4[%c0_6, %c0_7] : memref<128x128xbf16, #tpu.memory_space<vmem>>, vector<128x128xbf16>
    %cst_8 = arith.constant dense<0.000000e+00> : vector<8x128xf32>
    %10 = tpu.matmul %8, %9, %cst_8 {dimension_numbers = #tpu.dot_dimension_numbers<[1], [0], [0], [1], [0, 0, 1, 1], [], []>} : vector<8x128xbf16>, vector<128x128xbf16>, vector<8x128xf32> -> vector<8x128xf32>
    %c0_9 = arith.constant 0 : index
    %c0_10 = arith.constant 0 : index
    %11 = vector.load %arg5[%c0_9, %c0_10] : memref<1x128xf32, #tpu.memory_space<vmem>>, vector<1x128xf32>
    %12 = vector.broadcast %11 : vector<1x128xf32> to vector<8x128xf32>
    %13 = arith.addf %10, %12 : vector<8x128xf32>
    %c0_11 = arith.constant 0 : index
    %c0_12 = arith.constant 0 : index
    %14 = vector.load %arg6[%c0_11, %c0_12] : memref<8x128xf32, #tpu.memory_space<vmem>>, vector<8x128xf32>
    tpu.vector_store %arg6[%c0_11, %c0_12], %13 {strides = array<i32>} : memref<8x128xf32, #tpu.memory_space<vmem>>, vector<8x128xf32>,
    return
  }
  func.func @transform_0(%arg0: i32) -> (i32, i32) {
    %c0_i32 = arith.constant 0 : i32
    %c0_i32_0 = arith.constant 0 : i32
    return %arg0, %c0_i32 : i32, i32
  }
  func.func @transform_1(%arg0: i32) -> (i32, i32) {
    %c0_i32 = arith.constant 0 : i32
    %c0_i32_0 = arith.constant 0 : i32
    %c0_i32_1 = arith.constant 0 : i32
    return %c0_i32, %c0_i32_0 : i32, i32
  }
  func.func @transform_2(%arg0: i32) -> (i32, i32) {
    %c0_i32 = arith.constant 0 : i32
    %c0_i32_0 = arith.constant 0 : i32
    %c0_i32_1 = arith.constant 0 : i32
    return %c0_i32, %c0_i32_0 : i32, i32
  }
  func.func @transform_3(%arg0: i32) -> (i32, i32) {
    %c0_i32 = arith.constant 0 : i32
    %c0_i32_0 = arith.constant 0 : i32
    %c0_i32_1 = arith.constant 0 : i32
    return %c0_i32, %c0_i32_0 : i32, i32
  }
  func.func @transform_4(%arg0: i32) -> (i32, i32) {
    %c0_i32 = arith.constant 0 : i32
    %c0_i32_0 = arith.constant 0 : i32
    %c0_i32_1 = arith.constant 0 : i32
    return %c0_i32, %c0_i32_0 : i32, i32
  }
  func.func @transform_5(%arg0: i32) -> (i32, i32) {
    %c0_i32 = arith.constant 0 : i32
    %c0_i32_0 = arith.constant 0 : i32
    return %arg0, %c0_i32 : i32, i32
  }
}

</mosaic_0001>

<bundles_post_ra>
// kernel: cnn_forward.3
= control target key start
LH: loop header
LB: loop body
LE: loop exit
PB: predicated region body
PF: predicated region fallthrough
CT: control target
= control target key end

     0   :  { %v1199_v0 = vmov 0.0   ;;  %vm1200_vm0 = vmmov 0   ;;  %s1534_s1 = inlined_call_operand.vmem [shape: bf16[128,128], index: 1, kind: input, shape index: {}]   ;;  %s1535_s0 = inlined_call_operand.vmem [shape: bf16[4,104,128], index: 0, kind: input, shape index: {}]   ;;  %s1536_s2 = inlined_call_operand.vmem [shape: f32[1,128], index: 2, kind: input, shape index: {}]   ;;  %s1537_s3 = inlined_call_operand.vmem [shape: bf16[104,128], index: 3, kind: output, shape index: {}]  }
   0x1   :  { %985 = vmatprep.subr.bf16.mxu0 %v1199_v0  ;;  %1029 = vmatprep.subr.bf16.mxu1 %v1199_v0  ;;  %v1163_v1 = vld [vmem:[%s1534_s1 + $0x38] sm:$0xff]   ;;  %v1164_v2 = vld [vmem:[%s1534_s1 + $0x30] sm:$0xff]   ;;  %v1165_v3 = vld [vmem:[%s1534_s1 + $0x28] sm:$0xff]  }
   0x2   :  { %1001 = vmatprep.mubr.msk.bf16.mxu0 %vm1200_vm0, %v1199_v0  ;;  %1045 = vmatprep.mubr.msk.bf16.mxu1 %vm1200_vm0, %v1199_v0  ;;  %v1166_v4 = vld [vmem:[%s1534_s1 + $0x20] sm:$0xff]   ;;  %v1167_v5 = vld [vmem:[%s1534_s1 + $0x18] sm:$0xff]   ;;  %v1168_v6 = vld [vmem:[%s1534_s1 + $0x10] sm:$0xff]  }
   0x3   :  { %986 = vmatpush3.bf16.msra.mxu0 %v1163_v1  ;;  %1030 = vmatpush3.bf16.msra.mxu1 %v1163_v1  ;;  %v1169_v7 = vld [vmem:[%s1534_s1 + $0x8] sm:$0xff]   ;;  %v1170_v8 = vld [vmem:[%s1534_s1] sm:$0xff]   ;;  %v1172_v10 = vld [vmem:[%s1535_s0 + $0x34] sm:$0xff]  }
   0x4   :  { %987 = vmatprep.subr.bf16.mxu0 %v1199_v0  ;;  %1031 = vmatprep.subr.bf16.mxu1 %v1199_v0  ;;  %v1171_v9 = vld [vmem:[%s1535_s0] sm:$0xff]   ;;  %v1173_v11 = vld [vmem:[%s1535_s0 + $0x8] sm:$0xff]   ;;  %v1175_v13 = vld [vmem:[%s1535_s0 + $0x10] sm:$0xff]  }
   0x5   :  { %v1174_v12 = vld [vmem:[%s1535_s0 + $0x3c] sm:$0xff]   ;;  %v1176_v14 = vld [vmem:[%s1535_s0 + $0x44] sm:$0xff]   ;;  %v1178_v16 = vld [vmem:[%s1535_s0 + $0x4c] sm:$0xff]  }
   0x6   :  { %v1177_v15 = vld [vmem:[%s1535_s0 + $0x18] sm:$0xff]   ;;  %v1179_v17 = vld [vmem:[%s1535_s0 + $0x20] sm:$0xff]   ;;  %v1181_v19 = vld [vmem:[%s1535_s0 + $0x28] sm:$0xff]  }
   0x7   :  { %988 = vmatpush3.bf16.msra.mxu0 %v1164_v2  ;;  %1032 = vmatpush3.bf16.msra.mxu1 %v1164_v2  ;;  %v1180_v18 = vld [vmem:[%s1535_s0 + $0x54] sm:$0xff]   ;;  %v1182_v20 = vld [vmem:[%s1535_s0 + $0x5c] sm:$0xff]   ;;  %v1183_v21 = vld [vmem:[%s1535_s0 + $0x30] ss:$0 sps:$4 sm:$0xff]  }
   0x8   :  { %989 = vmatprep.subr.bf16.mxu0 %v1199_v0  ;;  %1033 = vmatprep.subr.bf16.mxu1 %v1199_v0  ;;  %v1184_v22 = vld [vmem:[%s1535_s0 + $0x64] ss:$0 sps:$4 sm:$0xff]   ;;  %v1185_v23 = vld [vmem:[%s1535_s0 + $0x68] sm:$0xff]   ;;  %v1186_v24 = vld [vmem:[%s1535_s0 + $0x9c] sm:$0xff]  }
   0x9   :  { %v1187_v25 = vld [vmem:[%s1535_s0 + $0x70] sm:$0xff]   ;;  %v1188_v26 = vld [vmem:[%s1535_s0 + $0xa4] sm:$0xff]   ;;  %v1189_v27 = vld [vmem:[%s1535_s0 + $0x78] sm:$0xff]  }
   0xa   :  { %v1190_v28 = vld [vmem:[%s1535_s0 + $0xac] sm:$0xff]   ;;  %v1191_v29 = vld [vmem:[%s1535_s0 + $0x80] sm:$0xff]   ;;  %v1192_v30 = vld [vmem:[%s1535_s0 + $0xb4] sm:$0xff]  }
   0xb   :  { %990 = vmatpush3.bf16.msra.mxu0 %v1165_v3  ;;  %1034 = vmatpush3.bf16.msra.mxu1 %v1165_v3  ;;  %v1193_v31 = vld [vmem:[%s1535_s0 + $0x88] sm:$0xff]   ;;  %v1194_v32 = vld [vmem:[%s1535_s0 + $0xbc] sm:$0xff]   ;;  %v1195_v33 = vld [vmem:[%s1535_s0 + $0x90] sm:$0xff]  }
   0xc   :  { %991 = vmatprep.subr.bf16.mxu0 %v1199_v0  ;;  %1035 = vmatprep.subr.bf16.mxu1 %v1199_v0  ;;  %v1196_v34 = vld [vmem:[%s1535_s0 + $0xc4] sm:$0xff]   ;;  %v1197_v35 = vld [vmem:[%s1535_s0 + $0x98] ss:$0 sps:$4 sm:$0xff]   ;;  %v1198_v36 = vld [vmem:[%s1535_s0 + $0xcc] ss:$0 sps:$4 sm:$0xff]  }
   0xf   :  { %992 = vmatpush3.bf16.msra.mxu0 %v1166_v4  ;;  %1036 = vmatpush3.bf16.msra.mxu1 %v1166_v4 }
  0x10   :  { %993 = vmatprep.subr.bf16.mxu0 %v1199_v0  ;;  %1037 = vmatprep.subr.bf16.mxu1 %v1199_v0 }
  0x13   :  { %994 = vmatpush3.bf16.msra.mxu0 %v1167_v5  ;;  %1038 = vmatpush3.bf16.msra.mxu1 %v1167_v5 }
  0x14   :  { %995 = vmatprep.subr.bf16.mxu0 %v1199_v0  ;;  %1039 = vmatprep.subr.bf16.mxu1 %v1199_v0 }
  0x17   :  { %996 = vmatpush3.bf16.msra.mxu0 %v1168_v6  ;;  %1040 = vmatpush3.bf16.msra.mxu1 %v1168_v6 }
  0x18   :  { %997 = vmatprep.subr.bf16.mxu0 %v1199_v0  ;;  %1041 = vmatprep.subr.bf16.mxu1 %v1199_v0 }
  0x1b   :  { %998 = vmatpush3.bf16.msra.mxu0 %v1169_v7  ;;  %1042 = vmatpush3.bf16.msra.mxu1 %v1169_v7 }
  0x1c   :  { %999 = vmatprep.subr.bf16.mxu0 %v1199_v0  ;;  %1043 = vmatprep.subr.bf16.mxu1 %v1199_v0 }
  0x1f   :  { %1000 = vmatpush3.bf16.msra.mxu0 %v1170_v8  ;;  %1044 = vmatpush3.bf16.msra.mxu1 %v1170_v8 }
  0x20   :  { %1073 = vmatprep.subr.bf16.mxu0 %v1199_v0  ;;  %1117 = vmatprep.subr.bf16.mxu1 %v1199_v0 }
  0x22   :  { %1002 = vmatmul.mubr.bf16.vlgmr.msra.gmra.mxu0 %v1171_v9  ;;  %1046 = vmatmul.mubr.bf16.vlgmr.msra.gmra.mxu1 %v1172_v10 }
  0x23   :  { %1074 = vmatpush3.bf16.msra.mxu0 %v1163_v1  ;;  %1118 = vmatpush3.bf16.msra.mxu1 %v1163_v1 }
  0x24   :  { %1005 = vmatprep.mubr.msk.bf16.mxu0 %vm1200_vm0, %v1199_v0  ;;  %1049 = vmatprep.mubr.msk.bf16.mxu1 %vm1200_vm0, %v1199_v0 }
  0x25   :  { %1075 = vmatprep.subr.bf16.mxu0 %v1199_v0  ;;  %1119 = vmatprep.subr.bf16.mxu1 %v1199_v0 }
  0x27   :  { %1076 = vmatpush3.bf16.msra.mxu0 %v1164_v2  ;;  %1120 = vmatpush3.bf16.msra.mxu1 %v1164_v2 }
  0x28   :  { %1077 = vmatprep.subr.bf16.mxu0 %v1199_v0  ;;  %1121 = vmatprep.subr.bf16.mxu1 %v1199_v0 }
  0x2a   :  { %1006 = vmatmul.mubr.bf16.gmra.mxu0 %v1173_v11  ;;  %1050 = vmatmul.mubr.bf16.gmra.mxu1 %v1174_v12 }
  0x2b   :  { %1009 = vmatprep.mubr.msk.bf16.mxu0 %vm1200_vm0, %v1199_v0  ;;  %1053 = vmatprep.mubr.msk.bf16.mxu1 %vm1200_vm0, %v1199_v0 }
  0x2c   :  { %1078 = vmatpush3.bf16.msra.mxu0 %v1165_v3  ;;  %1122 = vmatpush3.bf16.msra.mxu1 %v1165_v3 }
  0x2d   :  { %1079 = vmatprep.subr.bf16.mxu0 %v1199_v0  ;;  %1123 = vmatprep.subr.bf16.mxu1 %v1199_v0 }
  0x30   :  { %1080 = vmatpush3.bf16.msra.mxu0 %v1166_v4  ;;  %1124 = vmatpush3.bf16.msra.mxu1 %v1166_v4 }
  0x31   :  { %1081 = vmatprep.subr.bf16.mxu0 %v1199_v0  ;;  %1125 = vmatprep.subr.bf16.mxu1 %v1199_v0 }
  0x32   :  { %1010 = vmatmul.mubr.bf16.gmra.mxu0 %v1175_v13  ;;  %1054 = vmatmul.mubr.bf16.gmra.mxu1 %v1176_v14 }
  0x33   :  { %1013 = vmatprep.mubr.msk.bf16.mxu0 %vm1200_vm0, %v1199_v0  ;;  %1057 = vmatprep.mubr.msk.bf16.mxu1 %vm1200_vm0, %v1199_v0 }
  0x34   :  { %1082 = vmatpush3.bf16.msra.mxu0 %v1167_v5  ;;  %1126 = vmatpush3.bf16.msra.mxu1 %v1167_v5 }
  0x35   :  { %1083 = vmatprep.subr.bf16.mxu0 %v1199_v0  ;;  %1127 = vmatprep.subr.bf16.mxu1 %v1199_v0 }
  0x38   :  { %1084 = vmatpush3.bf16.msra.mxu0 %v1168_v6  ;;  %1128 = vmatpush3.bf16.msra.mxu1 %v1168_v6 }
  0x39   :  { %1085 = vmatprep.subr.bf16.mxu0 %v1199_v0  ;;  %1129 = vmatprep.subr.bf16.mxu1 %v1199_v0 }
  0x3a   :  { %1014 = vmatmul.mubr.bf16.gmra.mxu0 %v1177_v15  ;;  %1058 = vmatmul.mubr.bf16.gmra.mxu1 %v1178_v16 }
  0x3b   :  { %1017 = vmatprep.mubr.msk.bf16.mxu0 %vm1200_vm0, %v1199_v0  ;;  %1061 = vmatprep.mubr.msk.bf16.mxu1 %vm1200_vm0, %v1199_v0 }
  0x3c   :  { %1086 = vmatpush3.bf16.msra.mxu0 %v1169_v7  ;;  %1130 = vmatpush3.bf16.msra.mxu1 %v1169_v7 }
  0x3d   :  { %1087 = vmatprep.subr.bf16.mxu0 %v1199_v0  ;;  %1131 = vmatprep.subr.bf16.mxu1 %v1199_v0 }
  0x40   :  { %1088 = vmatpush3.bf16.msra.mxu0 %v1170_v8  ;;  %1132 = vmatpush3.bf16.msra.mxu1 %v1170_v8 }
  0x42   :  { %1018 = vmatmul.mubr.bf16.gmra.mxu0 %v1179_v17  ;;  %1062 = vmatmul.mubr.bf16.gmra.mxu1 %v1180_v18 }
  0x43   :  { %1021 = vmatprep.mubr.msk.bf16.mxu0 %vm1200_vm0, %v1199_v0  ;;  %1065 = vmatprep.mubr.msk.bf16.mxu1 %vm1200_vm0, %v1199_v0 }
  0x4a   :  { %1022 = vmatmul.mubr.bf16.gmra.mxu0 %v1181_v19  ;;  %1066 = vmatmul.mubr.bf16.gmra.mxu1 %v1182_v20 }
  0x4b   :  { %1025 = vmatprep.mubr.msk.bf16.mxu0 %vm1200_vm0, %v1199_v0  ;;  %1069 = vmatprep.mubr.msk.bf16.mxu1 %vm1200_vm0, %v1199_v0 }
  0x52   :  { %1026 = vmatmul.mubr.bf16.gmra.mxu0 %v1183_v21  ;;  %1070 = vmatmul.mubr.bf16.gmra.mxu1 %v1184_v22 }
  0x53   :  { %1089 = vmatprep.mubr.msk.bf16.mxu0 %vm1200_vm0, %v1199_v0  ;;  %1133 = vmatprep.mubr.msk.bf16.mxu1 %vm1200_vm0, %v1199_v0 }
  0x5a   :  { %1090 = vmatmul.mubr.bf16.vlgmr.msra.gmra.mxu0 %v1185_v23  ;;  %1134 = vmatmul.mubr.bf16.vlgmr.msra.gmra.mxu1 %v1186_v24 }
  0x5b   :  { %1093 = vmatprep.mubr.msk.bf16.mxu0 %vm1200_vm0, %v1199_v0  ;;  %1137 = vmatprep.mubr.msk.bf16.mxu1 %vm1200_vm0, %v1199_v0 }
  0x62   :  { %1094 = vmatmul.mubr.bf16.gmra.mxu0 %v1187_v25  ;;  %1138 = vmatmul.mubr.bf16.gmra.mxu1 %v1188_v26 }
  0x63   :  { %1097 = vmatprep.mubr.msk.bf16.mxu0 %vm1200_vm0, %v1199_v0  ;;  %1141 = vmatprep.mubr.msk.bf16.mxu1 %vm1200_vm0, %v1199_v0 }
  0x6a   :  { %1098 = vmatmul.mubr.bf16.gmra.mxu0 %v1189_v27  ;;  %1142 = vmatmul.mubr.bf16.gmra.mxu1 %v1190_v28 }
  0x6b   :  { %1101 = vmatprep.mubr.msk.bf16.mxu0 %vm1200_vm0, %v1199_v0  ;;  %1145 = vmatprep.mubr.msk.bf16.mxu1 %vm1200_vm0, %v1199_v0 }
  0x72   :  { %1102 = vmatmul.mubr.bf16.gmra.mxu0 %v1191_v29  ;;  %1146 = vmatmul.mubr.bf16.gmra.mxu1 %v1192_v30 }
  0x73   :  { %1105 = vmatprep.mubr.msk.bf16.mxu0 %vm1200_vm0, %v1199_v0  ;;  %1149 = vmatprep.mubr.msk.bf16.mxu1 %vm1200_vm0, %v1199_v0 }
  0x7a   :  { %1106 = vmatmul.mubr.bf16.gmra.mxu0 %v1193_v31  ;;  %1150 = vmatmul.mubr.bf16.gmra.mxu1 %v1194_v32 }
  0x7b   :  { %1109 = vmatprep.mubr.msk.bf16.mxu0 %vm1200_vm0, %v1199_v0  ;;  %1153 = vmatprep.mubr.msk.bf16.mxu1 %vm1200_vm0, %v1199_v0 }
  0x82   :  { %1110 = vmatmul.mubr.bf16.gmra.mxu0 %v1195_v33  ;;  %1154 = vmatmul.mubr.bf16.gmra.mxu1 %v1196_v34 }
  0x83   :  { %1113 = vmatprep.mubr.msk.bf16.mxu0 %vm1200_vm0, %v1199_v0  ;;  %1157 = vmatprep.mubr.msk.bf16.mxu1 %vm1200_vm0, %v1199_v0 }
  0x8a   :  { %1114 = vmatmul.mubr.bf16.gmra.mxu0 %v1197_v35  ;;  %1158 = vmatmul.mubr.bf16.gmra.mxu1 %v1198_v36  ;;  %v1474_v36 = vld [vmem:[%s1536_s2] ss:$0 sm:$0xff] }
  0xe2   :  { %v1417_v37 = vpop.f32.mrf.mxu0  ;;  %v1419_v38 = vpop.f32.mrf.mxu1 }
  0xe3   :  { %v646_v31 = vmax.f32 %v1417_v37, %v1419_v38 }
  0xe4   :  { %v1003_v39 = vpop.f32.mrf.mxu0  ;;  %v1047_v40 = vpop.f32.mrf.mxu1 }
  0xe6   :  { %v1421_v41 = vpop.f32.mrf.mxu0  ;;  %v1423_v42 = vpop.f32.mrf.mxu1 }
  0xe8   :  { %v1004_v43 = vpop.f32.mrf.mxu0  ;;  %v1048_v44 = vpop.f32.mrf.mxu1 }
  0xe9   :  { %v647_v43 = vmax.f32 %v1421_v41, %v1423_v42 }
  0xea   :  { %v1425_v45 = vpop.f32.mrf.mxu0  ;;  %v1427_v46 = vpop.f32.mrf.mxu1 }
  0xec   :  { %v1007_v47 = vpop.f32.mrf.mxu0  ;;  %v1051_v48 = vpop.f32.mrf.mxu1 }
  0xee   :  { %v1429_v49 = vpop.f32.mrf.mxu0  ;;  %v1431_v50 = vpop.f32.mrf.mxu1 }
  0xf0   :  { %v1008_v51 = vpop.f32.mrf.mxu0  ;;  %v1052_v52 = vpop.f32.mrf.mxu1 }
  0xf2   :  { %v1433_v53 = vpop.f32.mrf.mxu0  ;;  %v1435_v54 = vpop.f32.mrf.mxu1 }
  0xf4   :  { %v1011_v55 = vpop.f32.mrf.mxu0  ;;  %v1055_v56 = vpop.f32.mrf.mxu1 }
  0xf5   :  { %v648_v55 = vmax.f32 %v1425_v45, %v1427_v46 }
  0xf6   :  { %v1437_v57 = vpop.f32.mrf.mxu0  ;;  %v1439_v58 = vpop.f32.mrf.mxu1 }
  0xf8   :  { %v1012_v59 = vpop.f32.mrf.mxu0  ;;  %v1056_v60 = vpop.f32.mrf.mxu1 }
  0xfa   :  { %v1441_v61 = vpop.f32.mrf.mxu0  ;;  %v1443_v62 = vpop.f32.mrf.mxu1 }
  0xfc   :  { %v1015_v63 = vpop.f32.mrf.mxu0  ;;  %v1059_v0 = vpop.f32.mrf.mxu1 }
  0xfe   :  { %v1445_v1 = vpop.f32.mrf.mxu0  ;;  %v1447_v2 = vpop.f32.mrf.mxu1 }
 0x100   :  { %v1016_v3 = vpop.f32.mrf.mxu0  ;;  %v1060_v4 = vpop.f32.mrf.mxu1 }
 0x102   :  { %v1449_v5 = vpop.f32.mrf.mxu0  ;;  %v1451_v6 = vpop.f32.mrf.mxu1 }
 0x104   :  { %v1019_v7 = vpop.f32.mrf.mxu0  ;;  %v1063_v8 = vpop.f32.mrf.mxu1 }
 0x105   :  { %v649_v7 = vmax.f32 %v1429_v49, %v1431_v50 }
 0x106   :  { %v1453_v9 = vpop.f32.mrf.mxu0  ;;  %v1455_v10 = vpop.f32.mrf.mxu1 }
 0x108   :  { %v1020_v11 = vpop.f32.mrf.mxu0  ;;  %v1064_v12 = vpop.f32.mrf.mxu1 }
 0x10a   :  { %v1457_v13 = vpop.f32.mrf.mxu0  ;;  %v1459_v14 = vpop.f32.mrf.mxu1 }
 0x10c   :  { %v1023_v15 = vpop.f32.mrf.mxu0  ;;  %v1067_v16 = vpop.f32.mrf.mxu1 }
 0x10e   :  { %v1461_v17 = vpop.f32.mrf.mxu0  ;;  %v1463_v18 = vpop.f32.mrf.mxu1 }
 0x110   :  { %v1024_v19 = vpop.f32.mrf.mxu0  ;;  %v1068_v20 = vpop.f32.mrf.mxu1 }
 0x111   :  { %v650_v20 = vmax.f32 %v1433_v53, %v1435_v54 }
 0x112   :  { %v1465_v21 = vpop.f32.mrf.mxu0  ;;  %v1467_v22 = vpop.f32.mrf.mxu1 }
 0x114   :  { %v1027_v23 = vpop.f32.mrf.mxu0  ;;  %v1071_v24 = vpop.f32.mrf.mxu1 }
 0x116   :  { %v217_v25 = vpop.f32.mrf.mxu0  ;;  %v359_v26 = vpop.f32.mrf.mxu1 }
 0x118   :  { %v1028_v27 = vpop.f32.mrf.mxu0  ;;  %v1072_v28 = vpop.f32.mrf.mxu1 }
 0x11a   :  { %v450_v29 = vpop.f32.mrf.mxu0  ;;  %v592_v30 = vpop.f32.mrf.mxu1 }
 0x11b   :  { %v659_v32 = vmax.f32 %v450_v29, %v592_v30  ;;  %v651_v30 = vmax.f32 %v1437_v57, %v1439_v58 }
 0x11c   :  { %v1091_v33 = vpop.f32.mrf.mxu0  ;;  %v1135_v34 = vpop.f32.mrf.mxu1 }
 0x11d   :  { %v672_v35 = vmax.f32 %v646_v31, %v659_v32 }
 0x11e   :  { %v453_v39 = vpop.f32.mrf.mxu0  ;;  %v595_v40 = vpop.f32.mrf.mxu1 }
 0x11f   :  { %v660_v44 = vmax.f32 %v453_v39, %v595_v40  ;;  %v692_v51 = vadd.f32 %v1474_v36, %v672_v35  ;;  %v652_v40 = vmax.f32 %v1441_v61, %v1443_v62 }
 0x120   :  { %v1092_v47 = vpop.f32.mrf.mxu0  ;;  %v1136_v48 = vpop.f32.mrf.mxu1 }
 0x121   :  { %v673_v37 = vmax.f32 %v647_v43, %v660_v44  ;;  %v705_v0 = vmax.f32 %v692_v51, 0.0 }
 0x122   :  { %v458_v38 = vpop.f32.mrf.mxu0  ;;  %v600_v52 = vpop.f32.mrf.mxu1 }
 0x123   :  { %v693_v56 = vadd.f32 %v1474_v36, %v673_v37  ;;  %v661_v59 = vmax.f32 %v458_v38, %v600_v52  ;;  %v653_v52 = vmax.f32 %v1445_v1, %v1447_v2 }
 0x124   :  { %v1095_v60 = vpop.f32.mrf.mxu0  ;;  %v1139_v63 = vpop.f32.mrf.mxu1 }
 0x125   :  { %v706_v3 = vmax.f32 %v693_v56, 0.0  ;;  %v674_v4 = vmax.f32 %v648_v55, %v661_v59 }
 0x126   :  { %v461_v41 = vpop.f32.mrf.mxu0  ;;  %v603_v42 = vpop.f32.mrf.mxu1 }
 0x127   :  { %v893_v8 = vpack.c.bf16 %v706_v3, %v705_v0  ;;  %v662_v11 = vmax.f32 %v461_v41, %v603_v42  ;;  %v694_v45 = vadd.f32 %v1474_v36, %v674_v4  ;;  %v654_v3 = vmax.f32 %v1449_v5, %v1451_v6 }
 0x128   :  { %v1096_v12 = vpop.f32.mrf.mxu0  ;;  %v1140_v15 = vpop.f32.mrf.mxu1 }
 0x129   :  { %894 = vst [vmem:[%s1537_s3] sm:$0xff] %v893_v8   ;;  %v675_v46 = vmax.f32 %v649_v7, %v662_v11  ;;  %v707_v25 = vmax.f32 %v694_v45, 0.0  ;;  %v655_v15 = vmax.f32 %v1453_v9, %v1455_v10 }
 0x12a   :  { %v466_v16 = vpop.f32.mrf.mxu0  ;;  %v608_v19 = vpop.f32.mrf.mxu1 }
 0x12b   :  { %v695_v23 = vadd.f32 %v1474_v36, %v675_v46  ;;  %v663_v24 = vmax.f32 %v466_v16, %v608_v19 }
 0x12c   :  { %v1099_v49 = vpop.f32.mrf.mxu0  ;;  %v1143_v50 = vpop.f32.mrf.mxu1 }
 0x12d   :  { %v708_v26 = vmax.f32 %v695_v23, 0.0  ;;  %v676_v27 = vmax.f32 %v650_v20, %v663_v24  ;;  %v656_v24 = vmax.f32 %v1457_v13, %v1459_v14 }
 0x12e   :  { %v469_v28 = vpop.f32.mrf.mxu0  ;;  %v611_v29 = vpop.f32.mrf.mxu1 }
 0x12f   :  { %v898_v31 = vpack.c.bf16 %v708_v26, %v707_v25  ;;  %v664_v32 = vmax.f32 %v469_v28, %v611_v29  ;;  %v696_v53 = vadd.f32 %v1474_v36, %v676_v27 }
 0x130   :  { %v1100_v33 = vpop.f32.mrf.mxu0  ;;  %v1144_v34 = vpop.f32.mrf.mxu1 }
 0x131   :  { %920 = vst [vmem:[%s1537_s3 + $0x8] sm:$0xff] %v898_v31   ;;  %v677_v54 = vmax.f32 %v651_v30, %v664_v32  ;;  %v709_v47 = vmax.f32 %v696_v53, 0.0  ;;  %v657_v30 = vmax.f32 %v1461_v17, %v1463_v18 }
 0x132   :  { %v474_v35 = vpop.f32.mrf.mxu0  ;;  %v616_v39 = vpop.f32.mrf.mxu1 }
 0x133   :  { %v697_v43 = vadd.f32 %v1474_v36, %v677_v54  ;;  %v665_v44 = vmax.f32 %v474_v35, %v616_v39  ;;  %v658_v35 = vmax.f32 %v1465_v21, %v1467_v22 }
 0x134   :  { %v1103_v57 = vpop.f32.mrf.mxu0  ;;  %v1147_v58 = vpop.f32.mrf.mxu1 }
 0x135   :  { %v710_v48 = vmax.f32 %v697_v43, 0.0  ;;  %v678_v51 = vmax.f32 %v652_v40, %v665_v44 }
 0x136   :  { %v477_v37 = vpop.f32.mrf.mxu0  ;;  %v619_v38 = vpop.f32.mrf.mxu1 }
 0x137   :  { %v903_v55 = vpack.c.bf16 %v710_v48, %v709_v47  ;;  %v666_v56 = vmax.f32 %v477_v37, %v619_v38  ;;  %v698_v61 = vadd.f32 %v1474_v36, %v678_v51 }
 0x138   :  { %v1104_v59 = vpop.f32.mrf.mxu0  ;;  %v1148_v60 = vpop.f32.mrf.mxu1 }
 0x139   :  { %921 = vst [vmem:[%s1537_s3 + $0x10] sm:$0xff] %v903_v55   ;;  %v679_v62 = vmax.f32 %v653_v52, %v666_v56  ;;  %v711_v42 = vmax.f32 %v698_v61, 0.0 }
 0x13a   :  { %v482_v63 = vpop.f32.mrf.mxu0  ;;  %v624_v0 = vpop.f32.mrf.mxu1 }
 0x13b   :  { %v699_v4 = vadd.f32 %v1474_v36, %v679_v62  ;;  %v667_v41 = vmax.f32 %v482_v63, %v624_v0 }
 0x13c   :  { %v1107_v1 = vpop.f32.mrf.mxu0  ;;  %v1151_v2 = vpop.f32.mrf.mxu1 }
 0x13d   :  { %v712_v7 = vmax.f32 %v699_v4, 0.0  ;;  %v680_v8 = vmax.f32 %v654_v3, %v667_v41 }
 0x13e   :  { %v485_v11 = vpop.f32.mrf.mxu0  ;;  %v627_v12 = vpop.f32.mrf.mxu1 }
 0x13f   :  { %v908_v45 = vpack.c.bf16 %v712_v7, %v711_v42  ;;  %v668_v46 = vmax.f32 %v485_v11, %v627_v12  ;;  %v700_v5 = vadd.f32 %v1474_v36, %v680_v8 }
 0x140   :  { %v1108_v16 = vpop.f32.mrf.mxu0  ;;  %v1152_v19 = vpop.f32.mrf.mxu1 }
 0x141   :  { %922 = vst [vmem:[%s1537_s3 + $0x18] sm:$0xff] %v908_v45   ;;  %v681_v6 = vmax.f32 %v655_v15, %v668_v46  ;;  %v713_v25 = vmax.f32 %v700_v5, 0.0 }
 0x142   :  { %v490_v20 = vpop.f32.mrf.mxu0  ;;  %v632_v23 = vpop.f32.mrf.mxu1 }
 0x143   :  { %v701_v49 = vadd.f32 %v1474_v36, %v681_v6  ;;  %v669_v50 = vmax.f32 %v490_v20, %v632_v23 }
 0x144   :  { %v1111_v9 = vpop.f32.mrf.mxu0  ;;  %v1155_v10 = vpop.f32.mrf.mxu1 }
 0x145   :  { %v714_v26 = vmax.f32 %v701_v49, 0.0  ;;  %v682_v27 = vmax.f32 %v656_v24, %v669_v50 }
 0x146   :  { %v493_v28 = vpop.f32.mrf.mxu0  ;;  %v635_v29 = vpop.f32.mrf.mxu1 }
 0x147   :  { %v913_v31 = vpack.c.bf16 %v714_v26, %v713_v25  ;;  %v670_v32 = vmax.f32 %v493_v28, %v635_v29  ;;  %v702_v13 = vadd.f32 %v1474_v36, %v682_v27 }
 0x148   :  { %v1112_v33 = vpop.f32.mrf.mxu0  ;;  %v1156_v34 = vpop.f32.mrf.mxu1 }
 0x149   :  { %923 = vst [vmem:[%s1537_s3 + $0x20] sm:$0xff] %v913_v31   ;;  %v683_v14 = vmax.f32 %v657_v30, %v670_v32  ;;  %v715_v43 = vmax.f32 %v702_v13, 0.0 }
 0x14a   :  { %v498_v53 = vpop.f32.mrf.mxu0  ;;  %v640_v54 = vpop.f32.mrf.mxu1 }
 0x14b   :  { %v703_v39 = vadd.f32 %v1474_v36, %v683_v14  ;;  %v671_v40 = vmax.f32 %v498_v53, %v640_v54 }
 0x14c   :  { %v1115_v17 = vpop.f32.mrf.mxu0  ;;  %v1159_v18 = vpop.f32.mrf.mxu1 }
 0x14d   :  { %v716_v44 = vmax.f32 %v703_v39, 0.0  ;;  %v684_v57 = vmax.f32 %v658_v35, %v671_v40 }
 0x14e   :  { %v501_v58 = vpop.f32.mrf.mxu0  ;;  %v643_v47 = vpop.f32.mrf.mxu1 }
 0x14f   :  { %v918_v48 = vpack.c.bf16 %v716_v44, %v715_v43  ;;  %v704_v51 = vadd.f32 %v1474_v36, %v684_v57 }
 0x150   :  { %v1116_v37 = vpop.f32.mrf.mxu0  ;;  %v1160_v38 = vpop.f32.mrf.mxu1 }
 0x151   :  { %924 = vst [vmem:[%s1537_s3 + $0x28] sm:$0xff] %v918_v48   ;;  %v717_v21 = vmax.f32 %v704_v51, 0.0 }
 0x153   :  { %v889_v22 = vpack.c.bf16 %v717_v21, %v717_v21 }
 0x155   :  { %783 = vst [vmem:[%s1537_s3 + $0x30] sm:$0xf] %v889_v22 }

// kernel: cnn_forward.5
= control target key start
LH: loop header
LB: loop body
LE: loop exit
PB: predicated region body
PF: predicated region fallthrough
CT: control target
= control target key end

     0   :  { %v663_v39 = vmov 0.0   ;;  %vm664_vm0 = vmmov 0   ;;  %s830_s1 = inlined_call_operand.vmem [shape: bf16[512,128], index: 1, kind: input, shape index: {}]   ;;  %s831_s0 = inlined_call_operand.vmem [shape: bf16[8,512], index: 0, kind: input, shape index: {}]   ;;  %s832_s3 = inlined_call_operand.vmem [shape: bf16[128,128], index: 3, kind: input, shape index: {}]   ;;  %s833_s2 = inlined_call_operand.vmem [shape: f32[1,128], index: 2, kind: input, shape index: {}]   ;;  %s834_s4 = inlined_call_operand.vmem [shape: f32[1,128], index: 4, kind: input, shape index: {}]   ;;  %s835_s5 = inlined_call_operand.vmem [shape: f32[8,128], index: 5, kind: output, shape index: {}]  }
   0x1   :  { %v619_v0 = vld [vmem:[%s830_s1 + $0x78] sm:$0xff]   ;;  %v623_v4 = vld [vmem:[%s830_s1 + $0x70] sm:$0xff]   ;;  %v627_v8 = vld [vmem:[%s830_s1 + $0x68] sm:$0xff]  }
   0x2   :  { %v620_v1 = vld [vmem:[%s830_s1 + $0xf8] sm:$0xff]   ;;  %544 = vmatprep.subr.bf16.mxu0 %v619_v0  ;;  %v624_v5 = vld [vmem:[%s830_s1 + $0xf0] sm:$0xff]   ;;  %v628_v9 = vld [vmem:[%s830_s1 + $0xe8] sm:$0xff]  }
   0x3   :  { %v621_v2 = vld [vmem:[%s830_s1 + $0x38] sm:$0xff]   ;;  %566 = vmatprep.subr.bf16.mxu1 %v620_v1  ;;  %v625_v6 = vld [vmem:[%s830_s1 + $0x30] sm:$0xff]   ;;  %v629_v10 = vld [vmem:[%s830_s1 + $0x28] sm:$0xff]  }
   0x4   :  { %v622_v3 = vld [vmem:[%s830_s1 + $0xb8] sm:$0xff]   ;;  %545 = vmatpush3.bf16.msra.mxu0 %v621_v2  ;;  %v626_v7 = vld [vmem:[%s830_s1 + $0xb0] sm:$0xff]   ;;  %v630_v11 = vld [vmem:[%s830_s1 + $0xa8] sm:$0xff]  }
   0x5   :  { %567 = vmatpush3.bf16.msra.mxu1 %v622_v3  ;;  %546 = vmatprep.subr.bf16.mxu0 %v623_v4  ;;  %v631_v12 = vld [vmem:[%s830_s1 + $0x60] sm:$0xff]   ;;  %v635_v16 = vld [vmem:[%s830_s1 + $0x58] sm:$0xff]   ;;  %v639_v20 = vld [vmem:[%s830_s1 + $0x50] sm:$0xff]  }
   0x6   :  { %568 = vmatprep.subr.bf16.mxu1 %v624_v5  ;;  %v632_v13 = vld [vmem:[%s830_s1 + $0xe0] sm:$0xff]   ;;  %v636_v17 = vld [vmem:[%s830_s1 + $0xd8] sm:$0xff]   ;;  %v640_v21 = vld [vmem:[%s830_s1 + $0xd0] sm:$0xff]  }
   0x7   :  { %v633_v14 = vld [vmem:[%s830_s1 + $0x20] sm:$0xff]   ;;  %v637_v18 = vld [vmem:[%s830_s1 + $0x18] sm:$0xff]   ;;  %v641_v22 = vld [vmem:[%s830_s1 + $0x10] sm:$0xff]  }
   0x8   :  { %547 = vmatpush3.bf16.msra.mxu0 %v625_v6  ;;  %v634_v15 = vld [vmem:[%s830_s1 + $0xa0] sm:$0xff]   ;;  %v638_v19 = vld [vmem:[%s830_s1 + $0x98] sm:$0xff]   ;;  %v642_v23 = vld [vmem:[%s830_s1 + $0x90] sm:$0xff]  }
   0x9   :  { %569 = vmatpush3.bf16.msra.mxu1 %v626_v7  ;;  %548 = vmatprep.subr.bf16.mxu0 %v627_v8  ;;  %v643_v24 = vld [vmem:[%s830_s1 + $0x48] sm:$0xff]   ;;  %v647_v28 = vld [vmem:[%s830_s1 + $0x40] sm:$0xff]   ;;  %v655_v38 = vld [vmem:[%s832_s3 + $0x38] sm:$0xff]  }
   0xa   :  { %570 = vmatprep.subr.bf16.mxu1 %v628_v9  ;;  %v644_v25 = vld [vmem:[%s830_s1 + $0xc8] sm:$0xff]   ;;  %v648_v29 = vld [vmem:[%s830_s1 + $0xc0] sm:$0xff]   ;;  %v656_v40 = vld [vmem:[%s832_s3 + $0x30] sm:$0xff]  }
   0xb   :  { %v645_v26 = vld [vmem:[%s830_s1 + $0x8] sm:$0xff]   ;;  %v649_v30 = vld [vmem:[%s830_s1] sm:$0xff]   ;;  %v659_v43 = vld [vmem:[%s832_s3 + $0x18] sm:$0xff]  }
   0xc   :  { %549 = vmatpush3.bf16.msra.mxu0 %v629_v10  ;;  %v646_v27 = vld [vmem:[%s830_s1 + $0x88] sm:$0xff]   ;;  %v650_v31 = vld [vmem:[%s830_s1 + $0x80] sm:$0xff]   ;;  %v660_v44 = vld [vmem:[%s832_s3 + $0x10] sm:$0xff]  }
   0xd   :  { %571 = vmatpush3.bf16.msra.mxu1 %v630_v11  ;;  %550 = vmatprep.subr.bf16.mxu0 %v631_v12  ;;  %v21_v32 = vld [vmem:[%s831_s0] sm:$0xff]  ;;  %v22_v33 = vld [vmem:[%s831_s0 + $0x8] sm:$0xff] }
   0xe   :  { %572 = vmatprep.subr.bf16.mxu1 %v632_v13  ;;  %v499_v34 = vcombine.low %v21_v32, %v21_v32  ;;  %v500_v35 = vcombine.high %v21_v32, %v21_v32  ;;  %v501_v36 = vcombine.low %v22_v33, %v22_v33  ;;  %v502_v37 = vcombine.high %v22_v33, %v22_v33  ;;  %v657_v41 = vld [vmem:[%s832_s3 + $0x28] sm:$0xff]   ;;  %v658_v42 = vld [vmem:[%s832_s3 + $0x20] sm:$0xff]  }
   0xf   :  { %v661_v45 = vld [vmem:[%s832_s3 + $0x8] sm:$0xff]   ;;  %v662_v46 = vld [vmem:[%s832_s3] sm:$0xff]  }
  0x10   :  { %551 = vmatpush3.bf16.msra.mxu0 %v633_v14  ;;  %332 = vmatprep.mubr.bf16.mxu0 %v500_v35  ;;  %v498_v49 = vld [vmem:[%s833_s2] ss:$0 sm:$0xff] }
  0x11   :  { %573 = vmatpush3.bf16.msra.mxu1 %v634_v15  ;;  %552 = vmatprep.subr.bf16.mxu0 %v635_v16  ;;  %v535_v62 = vld [vmem:[%s834_s4] ss:$0 sm:$0xff] }
  0x12   :  { %574 = vmatprep.subr.bf16.mxu1 %v636_v17  ;;  %372 = vmatprep.mubr.bf16.mxu1 %v502_v37 }
  0x14   :  { %553 = vmatpush3.bf16.msra.mxu0 %v637_v18 }
  0x15   :  { %575 = vmatpush3.bf16.msra.mxu1 %v638_v19  ;;  %554 = vmatprep.subr.bf16.mxu0 %v639_v20 }
  0x16   :  { %576 = vmatprep.subr.bf16.mxu1 %v640_v21 }
  0x18   :  { %555 = vmatpush3.bf16.msra.mxu0 %v641_v22 }
  0x19   :  { %577 = vmatpush3.bf16.msra.mxu1 %v642_v23  ;;  %556 = vmatprep.subr.bf16.mxu0 %v643_v24 }
  0x1a   :  { %578 = vmatprep.subr.bf16.mxu1 %v644_v25 }
  0x1c   :  { %557 = vmatpush3.bf16.msra.mxu0 %v645_v26 }
  0x1d   :  { %579 = vmatpush3.bf16.msra.mxu1 %v646_v27  ;;  %558 = vmatprep.subr.bf16.mxu0 %v647_v28 }
  0x1e   :  { %580 = vmatprep.subr.bf16.mxu1 %v648_v29 }
  0x20   :  { %559 = vmatpush3.bf16.msra.mxu0 %v649_v30 }
  0x21   :  { %581 = vmatpush3.bf16.msra.mxu1 %v650_v31  ;;  %597 = vmatprep.subr.bf16.mxu0 %v663_v39 }
  0x23   :  { %333 = vmatmul.mubr.bf16.vlgmr.msra.gmra.mxu0 %v499_v34 }
  0x24   :  { %373 = vmatmul.mubr.bf16.vlgmr.msra.gmra.mxu1 %v501_v36  ;;  %598 = vmatpush3.bf16.msra.mxu0 %v655_v38 }
  0x25   :  { %599 = vmatprep.subr.bf16.mxu0 %v663_v39  ;;  %613 = vmatprep.mubr.msk.bf16.mxu0 %vm664_vm0, %v663_v39 }
  0x28   :  { %600 = vmatpush3.bf16.msra.mxu0 %v656_v40 }
  0x29   :  { %601 = vmatprep.subr.bf16.mxu0 %v663_v39 }
  0x2c   :  { %602 = vmatpush3.bf16.msra.mxu0 %v657_v41 }
  0x2d   :  { %603 = vmatprep.subr.bf16.mxu0 %v663_v39 }
  0x30   :  { %604 = vmatpush3.bf16.msra.mxu0 %v658_v42 }
  0x31   :  { %605 = vmatprep.subr.bf16.mxu0 %v663_v39 }
  0x34   :  { %606 = vmatpush3.bf16.msra.mxu0 %v659_v43 }
  0x35   :  { %607 = vmatprep.subr.bf16.mxu0 %v663_v39 }
  0x38   :  { %608 = vmatpush3.bf16.msra.mxu0 %v660_v44 }
  0x39   :  { %609 = vmatprep.subr.bf16.mxu0 %v663_v39 }
  0x3c   :  { %610 = vmatpush3.bf16.msra.mxu0 %v661_v45 }
  0x3d   :  { %611 = vmatprep.subr.bf16.mxu0 %v663_v39 }
  0x40   :  { %612 = vmatpush3.bf16.msra.mxu0 %v662_v46 }
  0xe3   :  { %v560_v47 = vpop.f32.mrf.mxu0 }
  0xe4   :  { %v582_v48 = vpop.f32.mrf.mxu1 }
  0xe5   :  { %v561_v50 = vpop.f32.mrf.mxu0 }
  0xe6   :  { %v583_v51 = vpop.f32.mrf.mxu1  ;;  %v562_v52 = vadd.f32 %v561_v50, %v560_v47 }
  0xe7   :  { %v563_v53 = vpop.f32.mrf.mxu0  ;;  %v584_v56 = vadd.f32 %v583_v51, %v582_v48 }
  0xe8   :  { %v585_v54 = vpop.f32.mrf.mxu1  ;;  %v335_v55 = vadd.f32 %v562_v52, %v498_v49 }
  0xe9   :  { %v564_v57 = vpop.f32.mrf.mxu0 }
  0xea   :  { %v586_v58 = vpop.f32.mrf.mxu1  ;;  %v375_v59 = vadd.f32 %v584_v56, %v335_v55 }
  0xec   :  { %v380_v60 = vmax.f32 %v375_v59, 0.0 }
  0xee   :  { %v381_v61 = vpack.c.bf16 %v380_v60, %v380_v60 }
  0xf0   :  { %614 = vmatmul.mubr.bf16.vlgmr.msra.gmra.mxu0 %v381_v61 }
 0x1b0   :  { %v487_v63 = vpop.f32.mrf.mxu0 }
 0x1b1   :  { %v488_v0 = vadd.f32 %v535_v62, %v487_v63 }
 0x1b2   :  { %v615_v1 = vpop.f32.mrf.mxu0 }
 0x1b3   :  { %493 = vst [vmem:[%s835_s5] sm:$0xff] %v488_v0 }
 0x1b4   :  { %v490_v2 = vpop.f32.mrf.mxu0 }
 0x1b6   :  { %v616_v3 = vpop.f32.mrf.mxu0 }

// kernel: cnn_forward.4
= control target key start
LH: loop header
LB: loop body
LE: loop exit
PB: predicated region body
PF: predicated region fallthrough
CT: control target
= control target key end

     0   :  { %vm2274_vm0 = vmmov 0   ;;  %s3092_s1 = inlined_call_operand.vmem [shape: bf16[1152,128], index: 1, kind: input, shape index: {}]   ;;  %s3093_s0 = inlined_call_operand.vmem [shape: bf16[4,8,1152], index: 0, kind: input, shape index: {}]   ;;  %s3094_s2 = inlined_call_operand.vmem [shape: f32[1,128], index: 2, kind: input, shape index: {}]   ;;  %s3095_s3 = inlined_call_operand.vmem [shape: bf16[8,128], index: 3, kind: output, shape index: {}]  }
   0x1   :  { %v2298_v0 = vld [vmem:[%s3092_s1 + $0x78] sm:$0xff]   ;;  %v2321_v4 = vld [vmem:[%s3092_s1 + $0x70] sm:$0xff]   ;;  %v2345_v8 = vld [vmem:[%s3092_s1 + $0x68] sm:$0xff]  }
   0x2   :  { %v2303_v1 = vld [vmem:[%s3092_s1 + $0xf8] sm:$0xff]   ;;  %1684 = vmatprep.subr.bf16.mxu0 %v2298_v0  ;;  %v2327_v5 = vld [vmem:[%s3092_s1 + $0xf0] sm:$0xff]   ;;  %v2351_v9 = vld [vmem:[%s3092_s1 + $0xe8] sm:$0xff]  }
   0x3   :  { %v2309_v2 = vld [vmem:[%s3092_s1 + $0x38] sm:$0xff]   ;;  %1706 = vmatprep.subr.bf16.mxu1 %v2303_v1  ;;  %v2333_v6 = vld [vmem:[%s3092_s1 + $0x30] sm:$0xff]   ;;  %v2357_v10 = vld [vmem:[%s3092_s1 + $0x28] sm:$0xff]  }
   0x4   :  { %v2315_v3 = vld [vmem:[%s3092_s1 + $0xb8] sm:$0xff]   ;;  %1685 = vmatpush3.bf16.msra.mxu0 %v2309_v2  ;;  %v2339_v7 = vld [vmem:[%s3092_s1 + $0xb0] sm:$0xff]   ;;  %v2363_v11 = vld [vmem:[%s3092_s1 + $0xa8] sm:$0xff]  }
   0x5   :  { %1707 = vmatpush3.bf16.msra.mxu1 %v2315_v3  ;;  %1686 = vmatprep.subr.bf16.mxu0 %v2321_v4  ;;  %v2369_v12 = vld [vmem:[%s3092_s1 + $0x60] sm:$0xff]   ;;  %v2393_v16 = vld [vmem:[%s3092_s1 + $0x58] sm:$0xff]   ;;  %v2417_v20 = vld [vmem:[%s3092_s1 + $0x50] sm:$0xff]  }
   0x6   :  { %1708 = vmatprep.subr.bf16.mxu1 %v2327_v5  ;;  %v2375_v13 = vld [vmem:[%s3092_s1 + $0xe0] sm:$0xff]   ;;  %3148 = vst [vmem:[#allocation2_spill] sm:$0xff] %v2393_v16  ;;  %v2399_v17 = vld [vmem:[%s3092_s1 + $0xd8] sm:$0xff]   ;;  %3150 = vst [vmem:[#allocation4_spill] sm:$0xff] %v2417_v20 }
   0x7   :  { %v2381_v14 = vld [vmem:[%s3092_s1 + $0x20] sm:$0xff]   ;;  %v2405_v18 = vld [vmem:[%s3092_s1 + $0x18] sm:$0xff]   ;;  %v2423_v21 = vld [vmem:[%s3092_s1 + $0xd0] sm:$0xff]  }
   0x8   :  { %1687 = vmatpush3.bf16.msra.mxu0 %v2333_v6  ;;  %v2387_v15 = vld [vmem:[%s3092_s1 + $0xa0] sm:$0xff]   ;;  %3149 = vst [vmem:[#allocation3_spill] sm:$0xff] %v2405_v18  ;;  %v2411_v19 = vld [vmem:[%s3092_s1 + $0x98] sm:$0xff]   ;;  %v2429_v22 = vld [vmem:[%s3092_s1 + $0x10] sm:$0xff]  }
   0x9   :  { %1709 = vmatpush3.bf16.msra.mxu1 %v2339_v7  ;;  %1688 = vmatprep.subr.bf16.mxu0 %v2345_v8  ;;  %3151 = vst [vmem:[#allocation5_spill] sm:$0xff] %v2429_v22  ;;  %v2435_v23 = vld [vmem:[%s3092_s1 + $0x90] sm:$0xff]   ;;  %v2441_v24 = vld [vmem:[%s3092_s1 + $0x48] sm:$0xff]   ;;  %v2465_v28 = vld [vmem:[%s3092_s1 + $0x40] sm:$0xff]  }
   0xa   :  { %1710 = vmatprep.subr.bf16.mxu1 %v2351_v9  ;;  %3152 = vst [vmem:[#allocation6_spill] sm:$0xff] %v2441_v24  ;;  %v2447_v25 = vld [vmem:[%s3092_s1 + $0xc8] sm:$0xff]   ;;  %3154 = vst [vmem:[#allocation8_spill] sm:$0xff] %v2465_v28  ;;  %v2471_v29 = vld [vmem:[%s3092_s1 + $0xc0] sm:$0xff]  }
   0xb   :  { %v2453_v26 = vld [vmem:[%s3092_s1 + $0x8] sm:$0xff]   ;;  %v2477_v30 = vld [vmem:[%s3092_s1] sm:$0xff]   ;;  %v2496_v38 = vld [vmem:[%s3092_s1 + $0x178] sm:$0xff]  }
   0xc   :  { %1689 = vmatpush3.bf16.msra.mxu0 %v2357_v10  ;;  %3153 = vst [vmem:[#allocation7_spill] sm:$0xff] %v2453_v26  ;;  %v2459_v27 = vld [vmem:[%s3092_s1 + $0x88] sm:$0xff]   ;;  %v2483_v31 = vld [vmem:[%s3092_s1 + $0x80] sm:$0xff]   ;;  %v2501_v39 = vld [vmem:[%s3092_s1 + $0x1f8] sm:$0xff]  }
   0xd   :  { %1711 = vmatpush3.bf16.msra.mxu1 %v2363_v11  ;;  %1690 = vmatprep.subr.bf16.mxu0 %v2369_v12  ;;  %v159_v32 = vld [vmem:[%s3093_s0] sm:$0xff]  ;;  %v160_v33 = vld [vmem:[%s3093_s0 + $0x8] sm:$0xff]  ;;  %v2506_v40 = vld [vmem:[%s3092_s1 + $0x138] sm:$0xff]  }
   0xe   :  { %1712 = vmatprep.subr.bf16.mxu1 %v2375_v13  ;;  %v1560_v34 = vcombine.low %v159_v32, %v159_v32  ;;  %v1561_v35 = vcombine.high %v159_v32, %v159_v32  ;;  %v1562_v36 = vcombine.low %v160_v33, %v160_v33  ;;  %v1563_v37 = vcombine.high %v160_v33, %v160_v33  ;;  %v2511_v41 = vld [vmem:[%s3092_s1 + $0x1b8] sm:$0xff]   ;;  %v2518_v42 = vld [vmem:[%s3092_s1 + $0x170] sm:$0xff]   ;;  %v2542_v46 = vld [vmem:[%s3092_s1 + $0x168] sm:$0xff]  }
   0xf   :  { %v2525_v43 = vld [vmem:[%s3092_s1 + $0x1f0] sm:$0xff]   ;;  %v2549_v47 = vld [vmem:[%s3092_s1 + $0x1e8] sm:$0xff]   ;;  %v2566_v50 = vld [vmem:[%s3092_s1 + $0x160] sm:$0xff]  }
  0x10   :  { %1691 = vmatpush3.bf16.msra.mxu0 %v2381_v14  ;;  %660 = vmatprep.mubr.bf16.mxu0 %v1561_v35  ;;  %v2531_v44 = vld [vmem:[%s3092_s1 + $0x130] sm:$0xff]   ;;  %v2555_v48 = vld [vmem:[%s3092_s1 + $0x128] sm:$0xff]   ;;  %v2573_v51 = vld [vmem:[%s3092_s1 + $0x1e0] sm:$0xff]  }
  0x11   :  { %1713 = vmatpush3.bf16.msra.mxu1 %v2387_v15  ;;  %1692 = vmatprep.subr.bf16.mxu0 %v2393_v16  ;;  %v2537_v45 = vld [vmem:[%s3092_s1 + $0x1b0] sm:$0xff]   ;;  %v2561_v49 = vld [vmem:[%s3092_s1 + $0x1a8] sm:$0xff]   ;;  %v2579_v52 = vld [vmem:[%s3092_s1 + $0x120] sm:$0xff]  }
  0x12   :  { %1714 = vmatprep.subr.bf16.mxu1 %v2399_v17  ;;  %700 = vmatprep.mubr.bf16.mxu1 %v1563_v37  ;;  %v2585_v53 = vld [vmem:[%s3092_s1 + $0x1a0] sm:$0xff]   ;;  %v2590_v54 = vld [vmem:[%s3092_s1 + $0x158] sm:$0xff]   ;;  %v2614_v58 = vld [vmem:[%s3092_s1 + $0x150] sm:$0xff]  }
  0x13   :  { %3155 = vst [vmem:[#allocation9_spill] sm:$0xff] %v2585_v53  ;;  %v2597_v55 = vld [vmem:[%s3092_s1 + $0x1d8] sm:$0xff]   ;;  %v2621_v59 = vld [vmem:[%s3092_s1 + $0x1d0] sm:$0xff]   ;;  %v2638_v62 = vld [vmem:[%s3092_s1 + $0x148] sm:$0xff]  }
  0x14   :  { %1693 = vmatpush3.bf16.msra.mxu0 %v2405_v18  ;;  %3156 = vst [vmem:[#allocation10_spill] sm:$0xff] %v2597_v55  ;;  %v2603_v56 = vld [vmem:[%s3092_s1 + $0x118] sm:$0xff]   ;;  %3158 = vst [vmem:[#allocation12_spill] sm:$0xff] %v2621_v59  ;;  %v2627_v60 = vld [vmem:[%s3092_s1 + $0x110] sm:$0xff]  }
  0x15   :  { %1715 = vmatpush3.bf16.msra.mxu1 %v2411_v19  ;;  %1694 = vmatprep.subr.bf16.mxu0 %v2417_v20  ;;  %v2609_v57 = vld [vmem:[%s3092_s1 + $0x198] sm:$0xff]   ;;  %v2633_v61 = vld [vmem:[%s3092_s1 + $0x190] sm:$0xff]   ;;  %v2645_v63 = vld [vmem:[%s3092_s1 + $0x1c8] sm:$0xff]  }
  0x16   :  { %1716 = vmatprep.subr.bf16.mxu1 %v2423_v21  ;;  %3157 = vst [vmem:[#allocation11_spill] sm:$0xff] %v2609_v57  ;;  %3159 = vst [vmem:[#allocation13_spill] sm:$0xff] %v2633_v61  ;;  %v2651_v32 = vld [vmem:[%s3092_s1 + $0x108] sm:$0xff]   ;;  %v2669_v35 = vld [vmem:[%s3092_s1 + $0x1c0] sm:$0xff]  }
  0x17   :  { %3160 = vst [vmem:[#allocation14_spill] sm:$0xff] %v2645_v63  ;;  %v2657_v33 = vld [vmem:[%s3092_s1 + $0x188] sm:$0xff]   ;;  %3162 = vst [vmem:[#allocation16_spill] sm:$0xff] %v2669_v35  ;;  %v2681_v37 = vld [vmem:[%s3092_s1 + $0x180] sm:$0xff]  }
  0x18   :  { %1695 = vmatpush3.bf16.msra.mxu0 %v2429_v22  ;;  %3161 = vst [vmem:[#allocation15_spill] sm:$0xff] %v2657_v33  ;;  %3164 = vst [vmem:[#allocation18_spill] sm:$0xff] %v2681_v37 }
  0x19   :  { %1717 = vmatpush3.bf16.msra.mxu1 %v2435_v23  ;;  %1696 = vmatprep.subr.bf16.mxu0 %v2441_v24 }
  0x1a   :  { %1718 = vmatprep.subr.bf16.mxu1 %v2447_v25 }
  0x1c   :  { %1697 = vmatpush3.bf16.msra.mxu0 %v2453_v26 }
  0x1d   :  { %1719 = vmatpush3.bf16.msra.mxu1 %v2459_v27  ;;  %1698 = vmatprep.subr.bf16.mxu0 %v2465_v28 }
  0x1e   :  { %1720 = vmatprep.subr.bf16.mxu1 %v2471_v29 }
  0x20   :  { %1699 = vmatpush3.bf16.msra.mxu0 %v2477_v30 }
  0x21   :  { %1721 = vmatpush3.bf16.msra.mxu1 %v2483_v31  ;;  %1728 = vmatprep.subr.bf16.mxu0 %v2496_v38 }
  0x22   :  { %1750 = vmatprep.subr.bf16.mxu1 %v2501_v39 }
  0x23   :  { %661 = vmatmul.mubr.bf16.vlgmr.msra.gmra.mxu0 %v1560_v34  ;;  %v2662_v34 = vld [vmem:[%s3092_s1 + $0x140] sm:$0xff]  }
  0x24   :  { %701 = vmatmul.mubr.bf16.vlgmr.msra.gmra.mxu1 %v1562_v36  ;;  %1729 = vmatpush3.bf16.msra.mxu0 %v2506_v40  ;;  %v2675_v36 = vld [vmem:[%s3092_s1 + $0x100] sm:$0xff]  }
  0x25   :  { %1751 = vmatpush3.bf16.msra.mxu1 %v2511_v41  ;;  %1730 = vmatprep.subr.bf16.mxu0 %v2518_v42  ;;  %3163 = vst [vmem:[#allocation17_spill] sm:$0xff] %v2675_v36 }
  0x26   :  { %1752 = vmatprep.subr.bf16.mxu1 %v2525_v43 }
  0x28   :  { %1731 = vmatpush3.bf16.msra.mxu0 %v2531_v44 }
  0x29   :  { %1753 = vmatpush3.bf16.msra.mxu1 %v2537_v45  ;;  %1732 = vmatprep.subr.bf16.mxu0 %v2542_v46 }
  0x2a   :  { %1754 = vmatprep.subr.bf16.mxu1 %v2549_v47 }
  0x2c   :  { %1733 = vmatpush3.bf16.msra.mxu0 %v2555_v48 }
  0x2d   :  { %1755 = vmatpush3.bf16.msra.mxu1 %v2561_v49  ;;  %1734 = vmatprep.subr.bf16.mxu0 %v2566_v50 }
  0x2e   :  { %1756 = vmatprep.subr.bf16.mxu1 %v2573_v51 }
  0x30   :  { %1735 = vmatpush3.bf16.msra.mxu0 %v2579_v52 }
  0x31   :  { %1757 = vmatpush3.bf16.msra.mxu1 %v2585_v53  ;;  %1736 = vmatprep.subr.bf16.mxu0 %v2590_v54  ;;  %v3124_v53 = vmov 0.0  }
  0x32   :  { %1758 = vmatprep.subr.bf16.mxu1 %v2597_v55  ;;  %v2694_v55 = vld [vmem:[%s3092_s1 + $0x238] sm:$0xff]  }
  0x33   :  { %3165 = vst [vmem:[#allocation19_spill] sm:$0xff] %v2694_v55 }
  0x34   :  { %1737 = vmatpush3.bf16.msra.mxu0 %v2603_v56 }
  0x35   :  { %1759 = vmatpush3.bf16.msra.mxu1 %v2609_v57  ;;  %1738 = vmatprep.subr.bf16.mxu0 %v2614_v58 }
  0x36   :  { %1760 = vmatprep.subr.bf16.mxu1 %v2621_v59  ;;  %v162_v59 = vld [vmem:[%s3093_s0 + $0x18] sm:$0xff] }
  0x37   :  { %v1567_v57 = vcombine.high %v162_v59, %v162_v59 }
  0x38   :  { %1739 = vmatpush3.bf16.msra.mxu0 %v2627_v60 }
  0x39   :  { %1761 = vmatpush3.bf16.msra.mxu1 %v2633_v61  ;;  %1740 = vmatprep.subr.bf16.mxu0 %v2638_v62 }
  0x3a   :  { %1762 = vmatprep.subr.bf16.mxu1 %v2645_v63  ;;  %780 = vmatprep.mubr.bf16.mxu1 %v1567_v57  ;;  %v2714_v57 = vld [vmem:[%s3092_s1 + $0x228] sm:$0xff]  }
  0x3b   :  { %3167 = vst [vmem:[#allocation21_spill] sm:$0xff] %v2714_v57 }
  0x3c   :  { %1741 = vmatpush3.bf16.msra.mxu0 %v2651_v32 }
  0x3d   :  { %1763 = vmatpush3.bf16.msra.mxu1 %v2657_v33  ;;  %1742 = vmatprep.subr.bf16.mxu0 %v2662_v34  ;;  %v161_v33 = vld [vmem:[%s3093_s0 + $0x10] sm:$0xff] }
  0x3e   :  { %1764 = vmatprep.subr.bf16.mxu1 %v2669_v35  ;;  %v1564_v63 = vcombine.low %v161_v33, %v161_v33  ;;  %v1565_v61 = vcombine.high %v161_v33, %v161_v33  ;;  %v1566_v35 = vcombine.low %v162_v59, %v162_v59  ;;  %v2703_v59 = vld [vmem:[%s3092_s1 + $0x230] sm:$0xff]   ;;  %v2726_v33 = vld [vmem:[%s3092_s1 + $0x220] sm:$0xff]  }
  0x3f   :  { %3166 = vst [vmem:[#allocation20_spill] sm:$0xff] %v2703_v59  ;;  %3168 = vst [vmem:[#allocation22_spill] sm:$0xff] %v2726_v33 }
  0x40   :  { %1743 = vmatpush3.bf16.msra.mxu0 %v2675_v36  ;;  %740 = vmatprep.mubr.bf16.mxu0 %v1565_v61  ;;  %v1641_v61 = vld [vmem:[%s3093_s0 + $0x24] sm:$0xff] }
  0x41   :  { %1765 = vmatpush3.bf16.msra.mxu1 %v2681_v37  ;;  %2072 = vmatprep.subr.bf16.mxu0 %v3124_v53 }
  0x42   :  { %1781 = vmatprep.subr.bf16.mxu1 %v2298_v0 }
  0x43   :  { %741 = vmatmul.mubr.bf16.vlgmr.msra.gmra.mxu0 %v1564_v63  ;;  %v1647_v63 = vcombine.high %v1641_v61, %v1641_v61 }
  0x44   :  { %781 = vmatmul.mubr.bf16.vlgmr.msra.gmra.mxu1 %v1566_v35  ;;  %2073 = vmatpush3.bf16.msra.mxu0 %v2694_v55  ;;  %v2735_v35 = vld [vmem:[%s3092_s1 + $0x218] sm:$0xff]  }
  0x45   :  { %1782 = vmatpush3.bf16.msra.mxu1 %v2309_v2  ;;  %2074 = vmatprep.subr.bf16.mxu0 %v3124_v53  ;;  %3169 = vst [vmem:[#allocation23_spill] sm:$0xff] %v2735_v35 }
  0x46   :  { %1783 = vmatprep.subr.bf16.mxu1 %v2321_v4  ;;  %2088 = vmatprep.mubr.msk.bf16.mxu0 %vm2274_vm0, %v3124_v53 }
  0x47   :  { %898 = vmatprep.mubr.bf16.mxu1 %v1647_v63  ;;  %v2744_v63 = vld [vmem:[%s3092_s1 + $0x210] sm:$0xff]  }
  0x48   :  { %2075 = vmatpush3.bf16.msra.mxu0 %v2703_v59  ;;  %3170 = vst [vmem:[#allocation24_spill] sm:$0xff] %v2744_v63 }
  0x49   :  { %1784 = vmatpush3.bf16.msra.mxu1 %v2333_v6  ;;  %2076 = vmatprep.subr.bf16.mxu0 %v3124_v53 }
  0x4a   :  { %1785 = vmatprep.subr.bf16.mxu1 %v2345_v8 }
  0x4c   :  { %2077 = vmatpush3.bf16.msra.mxu0 %v2714_v57 }
  0x4d   :  { %1786 = vmatpush3.bf16.msra.mxu1 %v2357_v10  ;;  %2078 = vmatprep.subr.bf16.mxu0 %v3124_v53 }
  0x4e   :  { %1787 = vmatprep.subr.bf16.mxu1 %v2369_v12 }
  0x50   :  { %2079 = vmatpush3.bf16.msra.mxu0 %v2726_v33 }
  0x51   :  { %1788 = vmatpush3.bf16.msra.mxu1 %v2381_v14  ;;  %2080 = vmatprep.subr.bf16.mxu0 %v3124_v53 }
  0x52   :  { %1789 = vmatprep.subr.bf16.mxu1 %v2393_v16  ;;  %v2753_v16 = vld [vmem:[%s3092_s1 + $0x208] sm:$0xff]  }
  0x53   :  { %3171 = vst [vmem:[#allocation25_spill] sm:$0xff] %v2753_v16 }
  0x54   :  { %2081 = vmatpush3.bf16.msra.mxu0 %v2735_v35 }
  0x55   :  { %1790 = vmatpush3.bf16.msra.mxu1 %v2405_v18  ;;  %2082 = vmatprep.subr.bf16.mxu0 %v3124_v53  ;;  %v1646_v18 = vcombine.low %v1641_v61, %v1641_v61 }
  0x56   :  { %1791 = vmatprep.subr.bf16.mxu1 %v2417_v20  ;;  %v2762_v20 = vld [vmem:[%s3092_s1 + $0x200] sm:$0xff]  }
  0x58   :  { %2083 = vmatpush3.bf16.msra.mxu0 %v2744_v63 }
  0x59   :  { %1792 = vmatpush3.bf16.msra.mxu1 %v2429_v22  ;;  %2084 = vmatprep.subr.bf16.mxu0 %v3124_v53  ;;  %v2234_v22 = vld [vmem:[%s3093_s0 + $0x20] ss:$0 sps:$4 sm:$0xff]  }
  0x5a   :  { %1793 = vmatprep.subr.bf16.mxu1 %v2441_v24  ;;  %v1642_v24 = vld [vmem:[%s3093_s0 + $0x2c] sm:$0xff] }
  0x5c   :  { %2085 = vmatpush3.bf16.msra.mxu0 %v2753_v16 }
  0x5d   :  { %1794 = vmatpush3.bf16.msra.mxu1 %v2453_v26  ;;  %2086 = vmatprep.subr.bf16.mxu0 %v3124_v53  ;;  %v1643_v26 = vld [vmem:[%s3093_s0 + $0x34] sm:$0xff]  ;;  %v1649_v53 = vcombine.high %v1642_v24, %v1642_v24 }
  0x5e   :  { %1795 = vmatprep.subr.bf16.mxu1 %v2465_v28  ;;  %v1651_v28 = vcombine.high %v1643_v26, %v1643_v26 }
  0x60   :  { %2087 = vmatpush3.bf16.msra.mxu0 %v2762_v20 }
  0x61   :  { %1796 = vmatpush3.bf16.msra.mxu1 %v2477_v30  ;;  %1803 = vmatprep.subr.bf16.mxu0 %v2303_v1 }
  0x62   :  { %1825 = vmatprep.subr.bf16.mxu1 %v2496_v38 }
  0x63   :  { %2089 = vmatmul.mubr.bf16.vlgmr.msra.gmra.mxu0 %v2234_v22  ;;  %v1650_v22 = vcombine.low %v1643_v26, %v1643_v26  ;;  %v3174_v26 = vld [vmem:[#allocation10_spill] sm:$0xff] }
  0x64   :  { %899 = vmatmul.mubr.bf16.vlgmr.msra.gmra.mxu1 %v1646_v18  ;;  %1804 = vmatpush3.bf16.msra.mxu0 %v2315_v3  ;;  %v1648_v18 = vcombine.low %v1642_v24, %v1642_v24  ;;  %v3173_v24 = vld [vmem:[#allocation9_spill] sm:$0xff] }
  0x65   :  { %1826 = vmatpush3.bf16.msra.mxu1 %v2506_v40  ;;  %1805 = vmatprep.subr.bf16.mxu0 %v2327_v5 }
  0x66   :  { %1827 = vmatprep.subr.bf16.mxu1 %v2518_v42  ;;  %938 = vmatprep.mubr.bf16.mxu0 %v1649_v53  ;;  %v3172_v53 = vmov 0.0  }
  0x67   :  { %978 = vmatprep.mubr.bf16.mxu1 %v1651_v28  ;;  %v1644_v28 = vld [vmem:[%s3093_s0 + $0x3c] sm:$0xff] }
  0x68   :  { %1806 = vmatpush3.bf16.msra.mxu0 %v2339_v7  ;;  %v1653_v61 = vcombine.high %v1644_v28, %v1644_v28 }
  0x69   :  { %1828 = vmatpush3.bf16.msra.mxu1 %v2531_v44  ;;  %1807 = vmatprep.subr.bf16.mxu0 %v2351_v9 }
  0x6a   :  { %1829 = vmatprep.subr.bf16.mxu1 %v2542_v46 }
  0x6c   :  { %1808 = vmatpush3.bf16.msra.mxu0 %v2363_v11 }
  0x6d   :  { %1830 = vmatpush3.bf16.msra.mxu1 %v2555_v48  ;;  %1809 = vmatprep.subr.bf16.mxu0 %v2375_v13 }
  0x6e   :  { %1831 = vmatprep.subr.bf16.mxu1 %v2566_v50 }
  0x70   :  { %1810 = vmatpush3.bf16.msra.mxu0 %v2387_v15 }
  0x71   :  { %1832 = vmatpush3.bf16.msra.mxu1 %v2579_v52  ;;  %1811 = vmatprep.subr.bf16.mxu0 %v2399_v17 }
  0x72   :  { %1833 = vmatprep.subr.bf16.mxu1 %v2590_v54 }
  0x74   :  { %1812 = vmatpush3.bf16.msra.mxu0 %v2411_v19 }
  0x75   :  { %1834 = vmatpush3.bf16.msra.mxu1 %v2603_v56  ;;  %1813 = vmatprep.subr.bf16.mxu0 %v2423_v21 }
  0x76   :  { %1835 = vmatprep.subr.bf16.mxu1 %v2614_v58 }
  0x78   :  { %1814 = vmatpush3.bf16.msra.mxu0 %v2435_v23 }
  0x79   :  { %1836 = vmatpush3.bf16.msra.mxu1 %v2627_v60  ;;  %1815 = vmatprep.subr.bf16.mxu0 %v2447_v25 }
  0x7a   :  { %1837 = vmatprep.subr.bf16.mxu1 %v2638_v62 }
  0x7c   :  { %1816 = vmatpush3.bf16.msra.mxu0 %v2459_v27 }
  0x7d   :  { %1838 = vmatpush3.bf16.msra.mxu1 %v2651_v32  ;;  %1817 = vmatprep.subr.bf16.mxu0 %v2471_v29 }
  0x7e   :  { %1839 = vmatprep.subr.bf16.mxu1 %v2662_v34 }
  0x80   :  { %1818 = vmatpush3.bf16.msra.mxu0 %v2483_v31 }
  0x81   :  { %1840 = vmatpush3.bf16.msra.mxu1 %v2675_v36  ;;  %1847 = vmatprep.subr.bf16.mxu0 %v2501_v39  ;;  %v1656_v36 = vld [vmem:[%s3093_s0 + $0x50] sm:$0xff] }
  0x82   :  { %2092 = vmatprep.subr.bf16.mxu1 %v3172_v53 }
  0x83   :  { %939 = vmatmul.mubr.bf16.vlgmr.msra.gmra.mxu0 %v1648_v18  ;;  %v3175_v18 = vld [vmem:[#allocation11_spill] sm:$0xff] }
  0x84   :  { %979 = vmatmul.mubr.bf16.vlgmr.msra.gmra.mxu1 %v1650_v22  ;;  %1848 = vmatpush3.bf16.msra.mxu0 %v2511_v41  ;;  %v3176_v22 = vld [vmem:[#allocation12_spill] sm:$0xff] }
  0x85   :  { %2093 = vmatpush3.bf16.msra.mxu1 %v2694_v55  ;;  %1849 = vmatprep.subr.bf16.mxu0 %v2525_v43  ;;  %v2243_v55 = vld [vmem:[%s3093_s0 + $0x44] ss:$0 sps:$4 sm:$0xff]  }
  0x86   :  { %2094 = vmatprep.subr.bf16.mxu1 %v3172_v53  ;;  %1018 = vmatprep.mubr.bf16.mxu0 %v1653_v61  ;;  %v3177_v61 = vld [vmem:[#allocation13_spill] sm:$0xff] }
  0x87   :  { %2108 = vmatprep.mubr.msk.bf16.mxu1 %vm2274_vm0, %v3172_v53 }
  0x88   :  { %1850 = vmatpush3.bf16.msra.mxu0 %v2537_v45 }
  0x89   :  { %2095 = vmatpush3.bf16.msra.mxu1 %v2703_v59  ;;  %1851 = vmatprep.subr.bf16.mxu0 %v2549_v47  ;;  %v3180_v59 = vld [vmem:[#allocation16_spill] sm:$0xff] }
  0x8a   :  { %2096 = vmatprep.subr.bf16.mxu1 %v3172_v53 }
  0x8c   :  { %1852 = vmatpush3.bf16.msra.mxu0 %v2561_v49 }
  0x8d   :  { %2097 = vmatpush3.bf16.msra.mxu1 %v2714_v57  ;;  %1853 = vmatprep.subr.bf16.mxu0 %v2573_v51  ;;  %v3178_v57 = vld [vmem:[#allocation14_spill] sm:$0xff] }
  0x8e   :  { %2098 = vmatprep.subr.bf16.mxu1 %v3172_v53 }
  0x90   :  { %1854 = vmatpush3.bf16.msra.mxu0 %v3173_v24 }
  0x91   :  { %2099 = vmatpush3.bf16.msra.mxu1 %v2726_v33  ;;  %1855 = vmatprep.subr.bf16.mxu0 %v3174_v26  ;;  %v3179_v33 = vld [vmem:[#allocation15_spill] sm:$0xff] }
  0x92   :  { %2100 = vmatprep.subr.bf16.mxu1 %v3172_v53 }
  0x94   :  { %1856 = vmatpush3.bf16.msra.mxu0 %v3175_v18 }
  0x95   :  { %2101 = vmatpush3.bf16.msra.mxu1 %v2735_v35  ;;  %1857 = vmatprep.subr.bf16.mxu0 %v3176_v22  ;;  %v1652_v35 = vcombine.low %v1644_v28, %v1644_v28 }
  0x96   :  { %2102 = vmatprep.subr.bf16.mxu1 %v3172_v53 }
  0x98   :  { %1858 = vmatpush3.bf16.msra.mxu0 %v3177_v61 }
  0x99   :  { %2103 = vmatpush3.bf16.msra.mxu1 %v2744_v63  ;;  %1859 = vmatprep.subr.bf16.mxu0 %v3178_v57  ;;  %v1655_v63 = vld [vmem:[%s3093_s0 + $0x48] sm:$0xff] }
  0x9a   :  { %2104 = vmatprep.subr.bf16.mxu1 %v3172_v53  ;;  %v1661_v28 = vcombine.high %v1655_v63, %v1655_v63 }
  0x9c   :  { %1860 = vmatpush3.bf16.msra.mxu0 %v3179_v33 }
  0x9d   :  { %2105 = vmatpush3.bf16.msra.mxu1 %v2753_v16  ;;  %1861 = vmatprep.subr.bf16.mxu0 %v3180_v59  ;;  %v1663_v16 = vcombine.high %v1656_v36, %v1656_v36 }
  0x9e   :  { %2106 = vmatprep.subr.bf16.mxu1 %v3172_v53 }
  0xa0   :  { %1862 = vmatpush3.bf16.msra.mxu0 %v2681_v37 }
  0xa1   :  { %2107 = vmatpush3.bf16.msra.mxu1 %v2762_v20  ;;  %1878 = vmatprep.subr.bf16.mxu0 %v2298_v0 }
  0xa2   :  { %1900 = vmatprep.subr.bf16.mxu1 %v2303_v1  ;;  %v3181_v1 = vld [vmem:[#allocation2_spill] sm:$0xff] }
  0xa3   :  { %1019 = vmatmul.mubr.bf16.vlgmr.msra.gmra.mxu0 %v1652_v35 }
  0xa4   :  { %2109 = vmatmul.mubr.bf16.vlgmr.msra.gmra.mxu1 %v2243_v55  ;;  %1879 = vmatpush3.bf16.msra.mxu0 %v2309_v2 }
  0xa5   :  { %1901 = vmatpush3.bf16.msra.mxu1 %v2315_v3  ;;  %1880 = vmatprep.subr.bf16.mxu0 %v2321_v4  ;;  %v3182_v3 = vld [vmem:[#allocation3_spill] sm:$0xff] }
  0xa6   :  { %1902 = vmatprep.subr.bf16.mxu1 %v2327_v5  ;;  %1136 = vmatprep.mubr.bf16.mxu0 %v1661_v28  ;;  %v3183_v5 = vld [vmem:[#allocation4_spill] sm:$0xff]  ;;  %v3188_v28 = vld [vmem:[#allocation17_spill] sm:$0xff] }
  0xa7   :  { %1176 = vmatprep.mubr.bf16.mxu1 %v1663_v16  ;;  %v1662_v16 = vcombine.low %v1656_v36, %v1656_v36 }
  0xa8   :  { %1881 = vmatpush3.bf16.msra.mxu0 %v2333_v6 }
  0xa9   :  { %1903 = vmatpush3.bf16.msra.mxu1 %v2339_v7  ;;  %1882 = vmatprep.subr.bf16.mxu0 %v2345_v8  ;;  %v3184_v7 = vld [vmem:[#allocation5_spill] sm:$0xff] }
  0xaa   :  { %1904 = vmatprep.subr.bf16.mxu1 %v2351_v9  ;;  %v3185_v9 = vld [vmem:[#allocation6_spill] sm:$0xff] }
  0xac   :  { %1883 = vmatpush3.bf16.msra.mxu0 %v2357_v10 }
  0xad   :  { %1905 = vmatpush3.bf16.msra.mxu1 %v2363_v11  ;;  %1884 = vmatprep.subr.bf16.mxu0 %v2369_v12  ;;  %v3186_v11 = vld [vmem:[#allocation7_spill] sm:$0xff] }
  0xae   :  { %1906 = vmatprep.subr.bf16.mxu1 %v2375_v13  ;;  %v3187_v13 = vld [vmem:[#allocation8_spill] sm:$0xff] }
  0xb0   :  { %1885 = vmatpush3.bf16.msra.mxu0 %v2381_v14 }
  0xb1   :  { %1907 = vmatpush3.bf16.msra.mxu1 %v2387_v15  ;;  %1886 = vmatprep.subr.bf16.mxu0 %v3181_v1  ;;  %v1660_v15 = vcombine.low %v1655_v63, %v1655_v63  ;;  %v2926_v63 = vld [vmem:[%s3093_s0 + $0x6c] sm:$0xff] }
  0xb2   :  { %1908 = vmatprep.subr.bf16.mxu1 %v2399_v17  ;;  %v1657_v17 = vld [vmem:[%s3093_s0 + $0x58] sm:$0xff] }
  0xb3   :  { %v1664_v36 = vcombine.low %v1657_v17, %v1657_v17 }
  0xb4   :  { %1887 = vmatpush3.bf16.msra.mxu0 %v3182_v3 }
  0xb5   :  { %1909 = vmatpush3.bf16.msra.mxu1 %v2411_v19  ;;  %1888 = vmatprep.subr.bf16.mxu0 %v3183_v5  ;;  %v1658_v19 = vld [vmem:[%s3093_s0 + $0x60] sm:$0xff] }
  0xb6   :  { %1910 = vmatprep.subr.bf16.mxu1 %v2423_v21  ;;  %v1665_v21 = vcombine.high %v1657_v17, %v1657_v17  ;;  %v1667_v55 = vcombine.high %v1658_v19, %v1658_v19  ;;  %v1666_v35 = vcombine.low %v1658_v19, %v1658_v19  ;;  %v3189_v17 = vld [vmem:[#allocation19_spill] sm:$0xff] }
  0xb8   :  { %1889 = vmatpush3.bf16.msra.mxu0 %v3184_v7 }
  0xb9   :  { %1911 = vmatpush3.bf16.msra.mxu1 %v2435_v23  ;;  %1890 = vmatprep.subr.bf16.mxu0 %v3185_v9 }
  0xba   :  { %1912 = vmatprep.subr.bf16.mxu1 %v2447_v25 }
  0xbc   :  { %1891 = vmatpush3.bf16.msra.mxu0 %v3186_v11 }
  0xbd   :  { %1913 = vmatpush3.bf16.msra.mxu1 %v2459_v27  ;;  %1892 = vmatprep.subr.bf16.mxu0 %v3187_v13 }
  0xbe   :  { %1914 = vmatprep.subr.bf16.mxu1 %v2471_v29 }
  0xc0   :  { %1893 = vmatpush3.bf16.msra.mxu0 %v2477_v30 }
  0xc1   :  { %1915 = vmatpush3.bf16.msra.mxu1 %v2483_v31  ;;  %1922 = vmatprep.subr.bf16.mxu0 %v2496_v38 }
  0xc2   :  { %1944 = vmatprep.subr.bf16.mxu1 %v2501_v39 }
  0xc3   :  { %1137 = vmatmul.mubr.bf16.vlgmr.msra.gmra.mxu0 %v1660_v15 }
  0xc4   :  { %1177 = vmatmul.mubr.bf16.vlgmr.msra.gmra.mxu1 %v1662_v16  ;;  %1923 = vmatpush3.bf16.msra.mxu0 %v2506_v40 }
  0xc5   :  { %1945 = vmatpush3.bf16.msra.mxu1 %v2511_v41  ;;  %1924 = vmatprep.subr.bf16.mxu0 %v2518_v42 }
  0xc6   :  { %1946 = vmatprep.subr.bf16.mxu1 %v2525_v43  ;;  %1216 = vmatprep.mubr.bf16.mxu0 %v1665_v21  ;;  %v1675_v21 = vcombine.high %v2926_v63, %v2926_v63 }
  0xc7   :  { %1256 = vmatprep.mubr.bf16.mxu1 %v1667_v55 }
  0xc8   :  { %1925 = vmatpush3.bf16.msra.mxu0 %v2531_v44 }
  0xc9   :  { %1947 = vmatpush3.bf16.msra.mxu1 %v2537_v45  ;;  %1926 = vmatprep.subr.bf16.mxu0 %v2542_v46 }
  0xca   :  { %1948 = vmatprep.subr.bf16.mxu1 %v2549_v47 }
  0xcc   :  { %1927 = vmatpush3.bf16.msra.mxu0 %v2555_v48 }
  0xcd   :  { %1949 = vmatpush3.bf16.msra.mxu1 %v2561_v49  ;;  %1928 = vmatprep.subr.bf16.mxu0 %v2566_v50 }
  0xce   :  { %1950 = vmatprep.subr.bf16.mxu1 %v2573_v51 }
  0xd0   :  { %1929 = vmatpush3.bf16.msra.mxu0 %v2579_v52 }
  0xd1   :  { %1951 = vmatpush3.bf16.msra.mxu1 %v3173_v24  ;;  %1930 = vmatprep.subr.bf16.mxu0 %v2590_v54 }
  0xd2   :  { %1952 = vmatprep.subr.bf16.mxu1 %v3174_v26 }
  0xd4   :  { %1931 = vmatpush3.bf16.msra.mxu0 %v2603_v56 }
  0xd5   :  { %1953 = vmatpush3.bf16.msra.mxu1 %v3175_v18  ;;  %1932 = vmatprep.subr.bf16.mxu0 %v2614_v58 }
  0xd6   :  { %1954 = vmatprep.subr.bf16.mxu1 %v3176_v22 }
  0xd8   :  { %1933 = vmatpush3.bf16.msra.mxu0 %v2627_v60 }
  0xd9   :  { %1955 = vmatpush3.bf16.msra.mxu1 %v3177_v61  ;;  %1934 = vmatprep.subr.bf16.mxu0 %v2638_v62 }
  0xda   :  { %1956 = vmatprep.subr.bf16.mxu1 %v3178_v57 }
  0xdc   :  { %1935 = vmatpush3.bf16.msra.mxu0 %v2651_v32 }
  0xdd   :  { %1957 = vmatpush3.bf16.msra.mxu1 %v3179_v33  ;;  %1936 = vmatprep.subr.bf16.mxu0 %v2662_v34 }
  0xde   :  { %1958 = vmatprep.subr.bf16.mxu1 %v3180_v59 }
  0xe0   :  { %1937 = vmatpush3.bf16.msra.mxu0 %v3188_v28 }
  0xe1   :  { %1959 = vmatpush3.bf16.msra.mxu1 %v2681_v37  ;;  %2112 = vmatprep.subr.bf16.mxu0 %v3172_v53 }
  0xe2   :  { %1975 = vmatprep.subr.bf16.mxu1 %v2298_v0 }
  0xe3   :  { %v1700_v15 = vpop.f32.mrf.mxu0  ;;  %1217 = vmatmul.mubr.bf16.vlgmr.msra.gmra.mxu0 %v1664_v36 }
  0xe4   :  { %v1722_v16 = vpop.f32.mrf.mxu1  ;;  %1257 = vmatmul.mubr.bf16.vlgmr.msra.gmra.mxu1 %v1666_v35  ;;  %2113 = vmatpush3.bf16.msra.mxu0 %v3189_v17  ;;  %v3190_v35 = vld [vmem:[#allocation20_spill] sm:$0xff] }
  0xe5   :  { %1976 = vmatpush3.bf16.msra.mxu1 %v2309_v2  ;;  %v1701_v19 = vpop.f32.mrf.mxu0  ;;  %2114 = vmatprep.subr.bf16.mxu0 %v3172_v53 }
  0xe6   :  { %v1723_v55 = vpop.f32.mrf.mxu1  ;;  %v1702_v59 = vadd.f32 %v1701_v19, %v1700_v15  ;;  %1977 = vmatprep.subr.bf16.mxu1 %v2321_v4  ;;  %2128 = vmatprep.mubr.msk.bf16.mxu0 %vm2274_vm0, %v3172_v53  ;;  %v3191_v15 = vld [vmem:[#allocation21_spill] sm:$0xff]  ;;  %v3192_v4 = vld [vmem:[#allocation22_spill] sm:$0xff] }
  0xe7   :  { %v1724_v33 = vadd.f32 %v1723_v55, %v1722_v16  ;;  %v1703_v0 = vpop.f32.mrf.mxu0  ;;  %1374 = vmatprep.mubr.bf16.mxu1 %v1675_v21 }
  0xe8   :  { %v1725_v37 = vpop.f32.mrf.mxu1  ;;  %2115 = vmatpush3.bf16.msra.mxu0 %v3190_v35 }
  0xe9   :  { %v703_v36 = vadd.f32 %v1724_v33, %v1702_v59  ;;  %1978 = vmatpush3.bf16.msra.mxu1 %v2333_v6  ;;  %v1704_v2 = vpop.f32.mrf.mxu0  ;;  %2116 = vmatprep.subr.bf16.mxu0 %v3172_v53  ;;  %v3193_v6 = vld [vmem:[#allocation23_spill] sm:$0xff]  ;;  %v2972_v37 = vld [vmem:[%s3093_s0 + $0x74] sm:$0xff]  ;;  %v2977_v59 = vld [vmem:[%s3093_s0 + $0x7c] sm:$0xff] }
  0xea   :  { %v1726_v57 = vpop.f32.mrf.mxu1  ;;  %1979 = vmatprep.subr.bf16.mxu1 %v2345_v8  ;;  %v3194_v8 = vld [vmem:[#allocation24_spill] sm:$0xff]  ;;  %v1677_v33 = vcombine.high %v2972_v37, %v2972_v37  ;;  %v2269_v2 = vld [vmem:[%s3092_s1 + $0xa0] sm:$0xff]  }
  0xeb   :  { %v2262_v57 = vld [vmem:[%s3092_s1 + $0xf8] sm:$0xff]  }
  0xec   :  { %2117 = vmatpush3.bf16.msra.mxu0 %v3191_v15 }
  0xed   :  { %1980 = vmatpush3.bf16.msra.mxu1 %v2357_v10  ;;  %2118 = vmatprep.subr.bf16.mxu0 %v3172_v53  ;;  %v3195_v10 = vld [vmem:[#allocation25_spill] sm:$0xff] }
  0xee   :  { %1981 = vmatprep.subr.bf16.mxu1 %v2369_v12  ;;  %v2252_v12 = vld [vmem:[%s3093_s0 + $0x68] ss:$0 sps:$4 sm:$0xff]  }
  0xf0   :  { %2119 = vmatpush3.bf16.msra.mxu0 %v3192_v4 }
  0xf1   :  { %1982 = vmatpush3.bf16.msra.mxu1 %v2381_v14  ;;  %2120 = vmatprep.subr.bf16.mxu0 %v3172_v53  ;;  %v1674_v14 = vcombine.low %v2926_v63, %v2926_v63 }
  0xf2   :  { %1983 = vmatprep.subr.bf16.mxu1 %v3181_v1  ;;  %v1679_v1 = vcombine.high %v2977_v59, %v2977_v59 }
  0xf4   :  { %2121 = vmatpush3.bf16.msra.mxu0 %v3193_v6 }
  0xf5   :  { %1984 = vmatpush3.bf16.msra.mxu1 %v3182_v3  ;;  %2122 = vmatprep.subr.bf16.mxu0 %v3172_v53 }
  0xf6   :  { %1985 = vmatprep.subr.bf16.mxu1 %v3183_v5 }
  0xf8   :  { %2123 = vmatpush3.bf16.msra.mxu0 %v3194_v8 }
  0xf9   :  { %1986 = vmatpush3.bf16.msra.mxu1 %v3184_v7  ;;  %2124 = vmatprep.subr.bf16.mxu0 %v3172_v53 }
  0xfa   :  { %1987 = vmatprep.subr.bf16.mxu1 %v3185_v9 }
  0xfc   :  { %2125 = vmatpush3.bf16.msra.mxu0 %v3195_v10 }
  0xfd   :  { %1988 = vmatpush3.bf16.msra.mxu1 %v3186_v11  ;;  %2126 = vmatprep.subr.bf16.mxu0 %v3172_v53 }
  0xfe   :  { %1989 = vmatprep.subr.bf16.mxu1 %v3187_v13 }
 0x100   :  { %2127 = vmatpush3.bf16.msra.mxu0 %v2762_v20 }
 0x101   :  { %1990 = vmatpush3.bf16.msra.mxu1 %v2477_v30  ;;  %1997 = vmatprep.subr.bf16.mxu0 %v2262_v57  ;;  %v2263_v30 = vld [vmem:[%s3092_s1 + $0xb8] sm:$0xff]  }
 0x102   :  { %2019 = vmatprep.subr.bf16.mxu1 %v2496_v38  ;;  %v2264_v38 = vld [vmem:[%s3092_s1 + $0xf0] sm:$0xff]  }
 0x103   :  { %v1744_v3 = vpop.f32.mrf.mxu0  ;;  %2129 = vmatmul.mubr.bf16.vlgmr.msra.gmra.mxu0 %v2252_v12 }
 0x104   :  { %v1766_v5 = vpop.f32.mrf.mxu1  ;;  %1375 = vmatmul.mubr.bf16.vlgmr.msra.gmra.mxu1 %v1674_v14  ;;  %1998 = vmatpush3.bf16.msra.mxu0 %v2263_v30 }
 0x105   :  { %2020 = vmatpush3.bf16.msra.mxu1 %v2506_v40  ;;  %v1745_v7 = vpop.f32.mrf.mxu0  ;;  %1999 = vmatprep.subr.bf16.mxu0 %v2264_v38  ;;  %v2265_v40 = vld [vmem:[%s3092_s1 + $0xb0] sm:$0xff]  }
 0x106   :  { %v1767_v9 = vpop.f32.mrf.mxu1  ;;  %2021 = vmatprep.subr.bf16.mxu1 %v2518_v42  ;;  %v1746_v11 = vadd.f32 %v1745_v7, %v1744_v3  ;;  %1414 = vmatprep.mubr.bf16.mxu0 %v1677_v33  ;;  %v2266_v42 = vld [vmem:[%s3092_s1 + $0xe8] sm:$0xff]  }
 0x107   :  { %v1768_v13 = vadd.f32 %v1767_v9, %v1766_v5  ;;  %1454 = vmatprep.mubr.bf16.mxu1 %v1679_v1  ;;  %v1747_v63 = vpop.f32.mrf.mxu0 }
 0x108   :  { %v1769_v16 = vpop.f32.mrf.mxu1  ;;  %v743_v21 = vadd.f32 %v1746_v11, %v703_v36  ;;  %2000 = vmatpush3.bf16.msra.mxu0 %v2265_v40  ;;  %v2267_v36 = vld [vmem:[%s3092_s1 + $0xa8] sm:$0xff]  }
 0x109   :  { %2022 = vmatpush3.bf16.msra.mxu1 %v2531_v44  ;;  %v1748_v19 = vpop.f32.mrf.mxu0  ;;  %2001 = vmatprep.subr.bf16.mxu0 %v2266_v42  ;;  %v2268_v44 = vld [vmem:[%s3092_s1 + $0xe0] sm:$0xff]  }
 0x10a   :  { %v1770_v55 = vpop.f32.mrf.mxu1  ;;  %2023 = vmatprep.subr.bf16.mxu1 %v2542_v46  ;;  %v783_v0 = vadd.f32 %v1768_v13, %v743_v21  ;;  %v2270_v46 = vld [vmem:[%s3092_s1 + $0xd8] sm:$0xff]  }
 0x10c   :  { %2002 = vmatpush3.bf16.msra.mxu0 %v2267_v36 }
 0x10d   :  { %2024 = vmatpush3.bf16.msra.mxu1 %v2555_v48  ;;  %2003 = vmatprep.subr.bf16.mxu0 %v2268_v44  ;;  %v2271_v48 = vld [vmem:[%s3092_s1 + $0x98] sm:$0xff]  }
 0x10e   :  { %2025 = vmatprep.subr.bf16.mxu1 %v2566_v50  ;;  %v2272_v50 = vld [vmem:[%s3092_s1 + $0xd0] sm:$0xff]  }
 0x110   :  { %2004 = vmatpush3.bf16.msra.mxu0 %v2269_v2 }
 0x111   :  { %2026 = vmatpush3.bf16.msra.mxu1 %v2579_v52  ;;  %2005 = vmatprep.subr.bf16.mxu0 %v2270_v46  ;;  %v1676_v52 = vcombine.low %v2972_v37, %v2972_v37 }
 0x112   :  { %2027 = vmatprep.subr.bf16.mxu1 %v2590_v54 }
 0x114   :  { %2006 = vmatpush3.bf16.msra.mxu0 %v2271_v48 }
 0x115   :  { %2028 = vmatpush3.bf16.msra.mxu1 %v2603_v56  ;;  %2007 = vmatprep.subr.bf16.mxu0 %v2272_v50 }
 0x116   :  { %2029 = vmatprep.subr.bf16.mxu1 %v2614_v58 }
 0x118   :  { %2008 = vmatpush3.bf16.msra.mxu0 %v2435_v23  ;;  %v1678_v23 = vcombine.low %v2977_v59, %v2977_v59 }
 0x119   :  { %2030 = vmatpush3.bf16.msra.mxu1 %v2627_v60  ;;  %2009 = vmatprep.subr.bf16.mxu0 %v2447_v25  ;;  %v1672_v25 = vld [vmem:[%s3093_s0 + $0x84] sm:$0xff] }
 0x11a   :  { %2031 = vmatprep.subr.bf16.mxu1 %v2638_v62 }
 0x11c   :  { %2010 = vmatpush3.bf16.msra.mxu0 %v2459_v27  ;;  %v1681_v27 = vcombine.high %v1672_v25, %v1672_v25 }
 0x11d   :  { %2032 = vmatpush3.bf16.msra.mxu1 %v2651_v32  ;;  %2011 = vmatprep.subr.bf16.mxu0 %v2471_v29 }
 0x11e   :  { %2033 = vmatprep.subr.bf16.mxu1 %v2662_v34  ;;  %v3199_v34 = vld [vmem:[#allocation18_spill] sm:$0xff] }
 0x120   :  { %2012 = vmatpush3.bf16.msra.mxu0 %v2483_v31 }
 0x121   :  { %2034 = vmatpush3.bf16.msra.mxu1 %v3188_v28  ;;  %2041 = vmatprep.subr.bf16.mxu0 %v2501_v39 }
 0x122   :  { %2132 = vmatprep.subr.bf16.mxu1 %v3172_v53 }
 0x123   :  { %v822_v29 = vpop.f32.mrf.mxu0  ;;  %1415 = vmatmul.mubr.bf16.vlgmr.msra.gmra.mxu0 %v1676_v52 }
 0x124   :  { %v1797_v54 = vpop.f32.mrf.mxu1  ;;  %1455 = vmatmul.mubr.bf16.vlgmr.msra.gmra.mxu1 %v1678_v23  ;;  %v3048_v56 = vadd.f32 %v822_v29, %v783_v0  ;;  %2042 = vmatpush3.bf16.msra.mxu0 %v2511_v41 }
 0x125   :  { %2133 = vmatpush3.bf16.msra.mxu1 %v3189_v17  ;;  %v2090_v58 = vpop.f32.mrf.mxu0  ;;  %2043 = vmatprep.subr.bf16.mxu0 %v2525_v43  ;;  %v3196_v43 = vld [vmem:[#allocation14_spill] sm:$0xff] }
 0x126   :  { %v1798_v60 = vpop.f32.mrf.mxu1  ;;  %2134 = vmatprep.subr.bf16.mxu1 %v3172_v53  ;;  %1494 = vmatprep.mubr.bf16.mxu0 %v1681_v27 }
 0x127   :  { %v1799_v31 = vadd.f32 %v1798_v60, %v1797_v54  ;;  %2148 = vmatprep.mubr.msk.bf16.mxu1 %vm2274_vm0, %v3172_v53  ;;  %v825_v39 = vpop.f32.mrf.mxu0 }
 0x128   :  { %v1800_v62 = vpop.f32.mrf.mxu1  ;;  %2044 = vmatpush3.bf16.msra.mxu0 %v2537_v45  ;;  %v3197_v45 = vld [vmem:[#allocation15_spill] sm:$0xff] }
 0x129   :  { %2135 = vmatpush3.bf16.msra.mxu1 %v3190_v35  ;;  %v2091_v41 = vpop.f32.mrf.mxu0  ;;  %2045 = vmatprep.subr.bf16.mxu0 %v2549_v47  ;;  %v3198_v47 = vld [vmem:[#allocation16_spill] sm:$0xff] }
 0x12a   :  { %v1801_v32 = vpop.f32.mrf.mxu1  ;;  %2136 = vmatprep.subr.bf16.mxu1 %v3172_v53 }
 0x12c   :  { %2046 = vmatpush3.bf16.msra.mxu0 %v2561_v49  ;;  %v1680_v49 = vcombine.low %v1672_v25, %v1672_v25 }
 0x12d   :  { %2137 = vmatpush3.bf16.msra.mxu1 %v3191_v15  ;;  %2047 = vmatprep.subr.bf16.mxu0 %v2573_v51  ;;  %v2261_v51 = vld [vmem:[%s3093_s0 + $0x8c] ss:$0 sps:$4 sm:$0xff]  }
 0x12e   :  { %2138 = vmatprep.subr.bf16.mxu1 %v3172_v53 }
 0x130   :  { %2048 = vmatpush3.bf16.msra.mxu0 %v3173_v24 }
 0x131   :  { %2139 = vmatpush3.bf16.msra.mxu1 %v3192_v4  ;;  %2049 = vmatprep.subr.bf16.mxu0 %v3174_v26 }
 0x132   :  { %2140 = vmatprep.subr.bf16.mxu1 %v3172_v53 }
 0x134   :  { %2050 = vmatpush3.bf16.msra.mxu0 %v3175_v18 }
 0x135   :  { %2141 = vmatpush3.bf16.msra.mxu1 %v3193_v6  ;;  %2051 = vmatprep.subr.bf16.mxu0 %v3176_v22 }
 0x136   :  { %2142 = vmatprep.subr.bf16.mxu1 %v3172_v53 }
 0x138   :  { %2052 = vmatpush3.bf16.msra.mxu0 %v3177_v61 }
 0x139   :  { %2143 = vmatpush3.bf16.msra.mxu1 %v3194_v8  ;;  %2053 = vmatprep.subr.bf16.mxu0 %v3196_v43 }
 0x13a   :  { %2144 = vmatprep.subr.bf16.mxu1 %v3172_v53 }
 0x13c   :  { %2054 = vmatpush3.bf16.msra.mxu0 %v3197_v45 }
 0x13d   :  { %2145 = vmatpush3.bf16.msra.mxu1 %v3195_v10  ;;  %2055 = vmatprep.subr.bf16.mxu0 %v3198_v47 }
 0x13e   :  { %2146 = vmatprep.subr.bf16.mxu1 %v3172_v53 }
 0x140   :  { %2056 = vmatpush3.bf16.msra.mxu0 %v3199_v34 }
 0x141   :  { %2147 = vmatpush3.bf16.msra.mxu1 %v2762_v20 }
 0x143   :  { %v1819_v24 = vpop.f32.mrf.mxu0  ;;  %1495 = vmatmul.mubr.bf16.vlgmr.msra.gmra.mxu0 %v1680_v49 }
 0x144   :  { %2149 = vmatmul.mubr.bf16.vlgmr.msra.gmra.mxu1 %v2261_v51  ;;  %v1841_v26 = vpop.f32.mrf.mxu1 }
 0x145   :  { %v1820_v18 = vpop.f32.mrf.mxu0 }
 0x146   :  { %v1842_v22 = vpop.f32.mrf.mxu1  ;;  %v1821_v61 = vadd.f32 %v1820_v18, %v1819_v24 }
 0x147   :  { %v1843_v28 = vadd.f32 %v1842_v22, %v1841_v26  ;;  %v1822_v17 = vpop.f32.mrf.mxu0 }
 0x148   :  { %v1844_v35 = vpop.f32.mrf.mxu1  ;;  %v941_v53 = vadd.f32 %v1821_v61, %v1799_v31 }
 0x149   :  { %v1823_v15 = vpop.f32.mrf.mxu0 }
 0x14a   :  { %v1845_v4 = vpop.f32.mrf.mxu1  ;;  %v981_v6 = vadd.f32 %v1843_v28, %v941_v53 }
 0x163   :  { %v1863_v8 = vpop.f32.mrf.mxu0 }
 0x164   :  { %v1060_v10 = vpop.f32.mrf.mxu1 }
 0x165   :  { %v1864_v12 = vpop.f32.mrf.mxu0 }
 0x166   :  { %v2110_v14 = vpop.f32.mrf.mxu1  ;;  %v1865_v37 = vadd.f32 %v1864_v12, %v1863_v8 }
 0x167   :  { %v1866_v20 = vpop.f32.mrf.mxu0 }
 0x168   :  { %v1063_v59 = vpop.f32.mrf.mxu1  ;;  %v1021_v57 = vadd.f32 %v1865_v37, %v981_v6  ;;  %v1683_v20 = vld [vmem:[%s3094_s2] ss:$0 sm:$0xff] }
 0x169   :  { %v1867_v33 = vpop.f32.mrf.mxu0 }
 0x16a   :  { %v2111_v1 = vpop.f32.mrf.mxu1  ;;  %v1061_v3 = vadd.f32 %v1060_v10, %v1021_v57 }
 0x16c   :  { %v1542_v5 = vmax.f32 %v3048_v56, %v1061_v3 }
 0x183   :  { %v1894_v30 = vpop.f32.mrf.mxu0 }
 0x184   :  { %v1916_v7 = vpop.f32.mrf.mxu1 }
 0x185   :  { %v1895_v9 = vpop.f32.mrf.mxu0 }
 0x186   :  { %v1917_v38 = vpop.f32.mrf.mxu1  ;;  %v1896_v11 = vadd.f32 %v1895_v9, %v1894_v30 }
 0x187   :  { %v1918_v13 = vadd.f32 %v1917_v38, %v1916_v7  ;;  %v1897_v63 = vpop.f32.mrf.mxu0 }
 0x188   :  { %v1919_v16 = vpop.f32.mrf.mxu1 }
 0x189   :  { %v1179_v21 = vadd.f32 %v1918_v13, %v1896_v11  ;;  %v1898_v40 = vpop.f32.mrf.mxu0 }
 0x18a   :  { %v1920_v19 = vpop.f32.mrf.mxu1 }
 0x1a3   :  { %v1938_v55 = vpop.f32.mrf.mxu0 }
 0x1a4   :  { %v1960_v42 = vpop.f32.mrf.mxu1 }
 0x1a5   :  { %v1939_v0 = vpop.f32.mrf.mxu0 }
 0x1a6   :  { %v1961_v36 = vpop.f32.mrf.mxu1  ;;  %v1940_v44 = vadd.f32 %v1939_v0, %v1938_v55 }
 0x1a7   :  { %v1962_v2 = vadd.f32 %v1961_v36, %v1960_v42  ;;  %v1941_v46 = vpop.f32.mrf.mxu0 }
 0x1a8   :  { %v1963_v48 = vpop.f32.mrf.mxu1  ;;  %v1219_v50 = vadd.f32 %v1940_v44, %v1179_v21 }
 0x1a9   :  { %v1942_v52 = vpop.f32.mrf.mxu0 }
 0x1aa   :  { %v1964_v23 = vpop.f32.mrf.mxu1  ;;  %v1259_v25 = vadd.f32 %v1962_v2, %v1219_v50 }
 0x1c3   :  { %v1298_v27 = vpop.f32.mrf.mxu0 }
 0x1c4   :  { %v1991_v29 = vpop.f32.mrf.mxu1  ;;  %v1299_v54 = vadd.f32 %v1298_v27, %v1259_v25 }
 0x1c5   :  { %v2130_v56 = vpop.f32.mrf.mxu0 }
 0x1c6   :  { %v1992_v58 = vpop.f32.mrf.mxu1 }
 0x1c7   :  { %v1301_v60 = vpop.f32.mrf.mxu0  ;;  %v1993_v26 = vadd.f32 %v1992_v58, %v1991_v29 }
 0x1c8   :  { %v1994_v31 = vpop.f32.mrf.mxu1 }
 0x1c9   :  { %v2131_v39 = vpop.f32.mrf.mxu0 }
 0x1ca   :  { %v1995_v62 = vpop.f32.mrf.mxu1 }
 0x1e3   :  { %v2013_v41 = vpop.f32.mrf.mxu0 }
 0x1e4   :  { %v2035_v32 = vpop.f32.mrf.mxu1 }
 0x1e5   :  { %v2014_v43 = vpop.f32.mrf.mxu0 }
 0x1e6   :  { %v2036_v45 = vpop.f32.mrf.mxu1  ;;  %v2015_v24 = vadd.f32 %v2014_v43, %v2013_v41 }
 0x1e7   :  { %v2016_v47 = vpop.f32.mrf.mxu0  ;;  %v2037_v22 = vadd.f32 %v2036_v45, %v2035_v32 }
 0x1e8   :  { %v2038_v49 = vpop.f32.mrf.mxu1  ;;  %v1417_v18 = vadd.f32 %v2015_v24, %v1993_v26 }
 0x1e9   :  { %v2017_v51 = vpop.f32.mrf.mxu0 }
 0x1ea   :  { %v2039_v34 = vpop.f32.mrf.mxu1  ;;  %v1457_v53 = vadd.f32 %v2037_v22, %v1417_v18 }
 0x203   :  { %v2057_v61 = vpop.f32.mrf.mxu0 }
 0x204   :  { %v1536_v28 = vpop.f32.mrf.mxu1 }
 0x205   :  { %v2058_v17 = vpop.f32.mrf.mxu0 }
 0x206   :  { %v2150_v35 = vpop.f32.mrf.mxu1  ;;  %v2059_v15 = vadd.f32 %v2058_v17, %v2057_v61 }
 0x207   :  { %v2060_v4 = vpop.f32.mrf.mxu0 }
 0x208   :  { %v1539_v6 = vpop.f32.mrf.mxu1  ;;  %v1497_v8 = vadd.f32 %v2059_v15, %v1457_v53 }
 0x209   :  { %v2061_v10 = vpop.f32.mrf.mxu0 }
 0x20a   :  { %v2151_v12 = vpop.f32.mrf.mxu1  ;;  %v1537_v14 = vadd.f32 %v1536_v28, %v1497_v8 }
 0x20c   :  { %v1543_v37 = vmax.f32 %v1299_v54, %v1537_v14 }
 0x20e   :  { %v1544_v59 = vmax.f32 %v1542_v5, %v1543_v37 }
 0x210   :  { %v1552_v57 = vadd.f32 %v1683_v20, %v1544_v59 }
 0x212   :  { %v1553_v33 = vmax.f32 %v1552_v57, 0.0 }
 0x214   :  { %v1554_v1 = vpack.c.bf16 %v1553_v33, %v1553_v33 }
 0x216   :  { %1555 = vst [vmem:[%s3095_s3] sm:$0xf] %v1554_v1 }

</bundles_post_ra>
